<compile_context>
chip_gen: v5e
topology: v5e:2x2
jax: 0.10.0
libtpu: 0.0.40
codegen_flags: <defaults>
</compile_context>

<pallas_src>
import functools
import math

import jax
import jax.numpy as jnp
from jax.experimental import pallas as pl
from jax.experimental.pallas import tpu as pltpu

# Small, self-consistent synthetic config.
D_MODEL = 32
NHEAD = 4
HEAD_DIM = D_MODEL // NHEAD
DIM_FF = 64
NUM_LAYERS = 2
SEQ = 8
BATCH = 2
EPS = 1e-5  # nn.LayerNorm default

VEC_ROWS = 8     # packed-vector slab rows per layer
VEC_COLS = 128   # lane-dense slab width (>= 3*D_MODEL and >= DIM_FF)

_SQRT1_2 = 0.7071067811865476
_ERF_P = 0.3275911
_ERF_A = (0.254829592, -0.284496736, 1.421413741, -1.453152027, 1.061405429)


def _erf_poly(x):
    """Abramowitz & Stegun 7.1.26 erf approximation; max abs error ~1.5e-7.

    Uses only abs/exp/div/mul/add/select so it lowers cleanly in Mosaic
    (lax.erf has no guaranteed lowering).
    """
    a = jnp.abs(x)
    t = 1.0 / (1.0 + _ERF_P * a)
    a1, a2, a3, a4, a5 = _ERF_A
    poly = t * (a1 + t * (a2 + t * (a3 + t * (a4 + t * a5))))
    r = 1.0 - poly * jnp.exp(-a * a)
    return jnp.where(x >= 0, r, -r)


def _gelu_erf(x):
    # exact-erf GELU: matches PyTorch F.gelu (approximate='none') to ~1e-7.
    return 0.5 * x * (1.0 + _erf_poly(x * _SQRT1_2))


def fused_encoder_kernel(B, L, H, n_layers,
                         x_ref, wqkv_ref, wo_ref, w1_ref, w2_ref, vec_ref,
                         o_ref):
    """Whole encoder stack in one kernel body (grid=()); layers statically unrolled."""
    E = w2_ref.shape[2]          # d_model
    F = w1_ref.shape[2]          # dim_feedforward
    D = E // H                   # head_dim

    def layernorm(v, g, b):
        # var = E[x^2] - E[x]^2: the two reductions are independent; gamma folded
        # into the rsqrt factor.
        mu = jnp.mean(v, axis=-1, keepdims=True)
        ms = jnp.mean(v * v, axis=-1, keepdims=True)
        inv = jax.lax.rsqrt(ms - mu * mu + EPS) * g
        return (v - mu) * inv + b

    x = x_ref[...]                                        # (B*L, E) f32, stays resident

    for layer in range(n_layers):                         # static unroll (2 layers)
        wqkv = wqkv_ref[layer]                            # (E, 3E) pre-transposed, Q pre-scaled
        wo3 = wo_ref[layer]                               # (H, D, E) out-proj, head-major rows
        w1 = w1_ref[layer]                                # (E, F)
        w2 = w2_ref[layer]                                # (F, E)
        vecs = vec_ref[layer]                             # (VEC_ROWS, VEC_COLS)

        bqkv = vecs[0:1, :3 * E]                          # Q part pre-scaled at pack time
        bo = vecs[1:2, :E]
        g1 = vecs[2:3, :E]
        be1 = vecs[3:4, :E]
        b1 = vecs[4:5, :F]
        b2 = vecs[5:6, :E]
        g2 = vecs[6:7, :E]
        be2 = vecs[7:8, :E]

        # ---------------- self-attention block (pre-norm) ----------------
        xn = layernorm(x, g1, be1)
        qkv = jnp.dot(xn, wqkv, preferred_element_type=jnp.float32) + bqkv    # (B*L, 3E)

        # Split the 3E feature dim into 3*H head_dim chunks and stack them on the
        # leading (batch) axis with ONE concatenate.  Chunk c = j*H + h, row c*B + b.
        qkv3 = qkv.reshape(B, L, 3 * E)
        heads = jnp.concatenate(
            [qkv3[:, :, c * D:(c + 1) * D] for c in range(3 * H)], axis=0)    # (3*H*B, L, D)
        qh = heads[:H * B]                 # (H*B, L, D), softmax scale folded into Wq/bq
        kh = heads[H * B:2 * H * B]
        vh = heads[2 * H * B:]

        # scores / softmax / context: single-batch-dim contractions (batch = H*B).
        s = jax.lax.dot_general(qh, kh, (((2,), (2,)), ((0,), (0,))),
                                preferred_element_type=jnp.float32)           # (H*B, L, L)
        s = s - jnp.max(s, axis=-1, keepdims=True)
        p = jnp.exp(s)
        p = p / jnp.sum(p, axis=-1, keepdims=True)        # exact divide (correctness)

        ctx = jax.lax.dot_general(p, vh, (((2,), (1,)), ((0,), (0,))),
                                  preferred_element_type=jnp.float32)         # (H*B, L, D)

        # Head merge folded into the output projection: no concat, just a head-batched
        # matmul against the (H, D, E)-packed Wo and a sum over the head axis.
        ctx = ctx.reshape(H, B * L, D)                    # contiguity-preserving regroup
        attn = jax.lax.dot_general(ctx, wo3, (((2,), (1,)), ((0,), (0,))),
                                   preferred_element_type=jnp.float32)        # (H, B*L, E)
        attn = jnp.sum(attn, axis=0) + bo                                     # (B*L, E)
        x = x + attn

        # ---------------- feed-forward block (pre-norm, exact GELU) ----------------
        xn2 = layernorm(x, g2, be2)
        h1 = _gelu_erf(jnp.dot(xn2, w1, preferred_element_type=jnp.float32) + b1)
        x = x + jnp.dot(h1, w2, preferred_element_type=jnp.float32) + b2

    o_ref[...] = x


def pack_params(layer_params):
    """Stack per-layer PyTorch-layout params into kernel-friendly tensors.

    - weights pre-transposed to (in, out); Wo additionally reshaped to (H, D, E)
      so the head merge folds into the output projection
    - softmax scale 1/sqrt(head_dim) folded into the Q rows of in_proj
    - all 1-D vectors (biases, LN gamma/beta) packed into one (8, 128) slab
    """
    E, F, H, D = D_MODEL, DIM_FF, NHEAD, HEAD_DIM
    scale = 1.0 / math.sqrt(D)
    wqkv_s, wo_s, w1_s, w2_s, vec_s = [], [], [], [], []
    for (wqkv, bqkv, wo, bo, g1, be1, w1, b1, w2, b2, g2, be2) in layer_params:
        wqkv_f = wqkv.at[:E].multiply(scale)           # scale Q projection weights
        bqkv_f = bqkv.at[:E].multiply(scale)           # ... and Q bias
        wqkv_s.append(wqkv_f.T)                        # (E, 3E)
        wo_s.append(wo.T.reshape(H, D, E))             # (H, D, E): row h*D+d of wo.T
        w1_s.append(w1.T)                              # (E, F)
        w2_s.append(w2.T)                              # (F, E)
        vec = jnp.zeros((VEC_ROWS, VEC_COLS), jnp.float32)
        vec = vec.at[0, :3 * E].set(bqkv_f)
        vec = vec.at[1, :E].set(bo)
        vec = vec.at[2, :E].set(g1)
        vec = vec.at[3, :E].set(be1)
        vec = vec.at[4, :F].set(b1)
        vec = vec.at[5, :E].set(b2)
        vec = vec.at[6, :E].set(g2)
        vec = vec.at[7, :E].set(be2)
        vec_s.append(vec)
    return (jnp.stack(wqkv_s), jnp.stack(wo_s), jnp.stack(w1_s),
            jnp.stack(w2_s), jnp.stack(vec_s))


def transformer_encoder(x, layer_params):
    """Stack of NUM_LAYERS encoder layers in ONE fused pallas_call, grid=()."""
    B, L, E = x.shape
    n_layers = len(layer_params)
    wqkv_s, wo_s, w1_s, w2_s, vec_s = pack_params(layer_params)

    x2 = x.reshape(B * L, E)   # fold batch into the matmul M dimension

    kernel = functools.partial(fused_encoder_kernel, B, L, NHEAD, n_layers)

    out = pl.pallas_call(
        kernel,
        out_shape=jax.ShapeDtypeStruct((B * L, E), jnp.float32),
        # No grid: every operand is one whole-array DMA into VMEM, total < 100 KB.
        in_specs=[pl.BlockSpec(memory_space=pltpu.MemorySpace.VMEM)] * 6,
        out_specs=pl.BlockSpec(memory_space=pltpu.MemorySpace.VMEM),
    )(x2, wqkv_s, wo_s, w1_s, w2_s, vec_s)

    return out.reshape(B, L, E)


# ----- deterministic parameter construction (synthetic, PyTorch layout) -----
def init_layer_params(key):
    ks = jax.random.split(key, 8)
    E, F = D_MODEL, DIM_FF
    wqkv = jax.random.normal(ks[0], (3 * E, E), jnp.float32) / math.sqrt(E)
    bqkv = 0.02 * jax.random.normal(ks[1], (3 * E,), jnp.float32)
    wo = jax.random.normal(ks[2], (E, E), jnp.float32) / math.sqrt(E)
    bo = 0.02 * jax.random.normal(ks[3], (E,), jnp.float32)
    g1 = jnp.ones((E,), jnp.float32)
    be1 = jnp.zeros((E,), jnp.float32)
    w1 = jax.random.normal(ks[4], (F, E), jnp.float32) / math.sqrt(E)
    b1 = 0.02 * jax.random.normal(ks[5], (F,), jnp.float32)
    w2 = jax.random.normal(ks[6], (E, F), jnp.float32) / math.sqrt(F)
    b2 = 0.02 * jax.random.normal(ks[7], (E,), jnp.float32)
    g2 = jnp.ones((E,), jnp.float32)
    be2 = jnp.zeros((E,), jnp.float32)
    return (wqkv, bqkv, wo, bo, g1, be1, w1, b1, w2, b2, g2, be2)


# ----- pure-JAX reference (mirrors the PyTorch forward: pre-norm + exact GELU) -----
def reference_layer(x, params):
    (wqkv, bqkv, wo, bo, g1, be1, w1, b1, w2, b2, g2, be2) = params
    E = D_MODEL

    def ln(v, g, b):
        mu = jnp.mean(v, axis=-1, keepdims=True)
        var = jnp.mean((v - mu) ** 2, axis=-1, keepdims=True)
        return (v - mu) / jnp.sqrt(var + EPS) * g + b

    # src2 = norm1(src); MHA(src2, src2, src2); residual
    x2 = ln(x, g1, be1)
    qkv = x2 @ wqkv.T + bqkv
    q, k, v = qkv[..., :E], qkv[..., E:2 * E], qkv[..., 2 * E:]
    B, L, _ = x.shape
    q = q.reshape(B, L, NHEAD, HEAD_DIM).transpose(0, 2, 1, 3)
    k = k.reshape(B, L, NHEAD, HEAD_DIM).transpose(0, 2, 1, 3)
    v = v.reshape(B, L, NHEAD, HEAD_DIM).transpose(0, 2, 1, 3)
    s = jnp.einsum("bhld,bhmd->bhlm", q, k) / math.sqrt(HEAD_DIM)
    p = jax.nn.softmax(s, axis=-1)
    o = jnp.einsum("bhlm,bhmd->bhld", p, v).transpose(0, 2, 1, 3).reshape(B, L, E)
    x = x + (o @ wo.T + bo)

    # src2 = norm2(src); linear2(gelu(linear1(src2))); residual  (exact erf GELU)
    x2 = ln(x, g2, be2)
    ff = jax.nn.gelu(x2 @ w1.T + b1, approximate=False) @ w2.T + b2
    return x + ff


if __name__ == "__main__":
    key = jax.random.PRNGKey(0)
    k_x, k_p = jax.random.split(key)
    x = jax.random.normal(k_x, (BATCH, SEQ, D_MODEL), jnp.float32)

    layer_keys = jax.random.split(k_p, NUM_LAYERS)
    layer_params = [init_layer_params(k) for k in layer_keys]

    out = jax.block_until_ready(transformer_encoder(x, layer_params))

    ref = x
    for prm in layer_params:
        ref = reference_layer(ref, prm)

    assert out.shape == (BATCH, SEQ, D_MODEL)
    assert jnp.allclose(out, ref, rtol=1e-3, atol=1e-3), (
        f"mismatch vs reference: max abs diff {jnp.max(jnp.abs(out - ref))}")

    print("KERNEL_OK")
</pallas_src>

<mosaic_0001>
module attributes {stable_mosaic.version = 11 : i64} {
  func.func @fused_encoder_kernel(%arg0: memref<16x32xf32, #tpu.memory_space<vmem>>, %arg1: memref<2x32x96xf32, #tpu.memory_space<vmem>>, %arg2: memref<2x4x8x32xf32, #tpu.memory_space<vmem>>, %arg3: memref<2x32x64xf32, #tpu.memory_space<vmem>>, %arg4: memref<2x64x32xf32, #tpu.memory_space<vmem>>, %arg5: memref<2x8x128xf32, #tpu.memory_space<vmem>>, %arg6: memref<16x32xf32, #tpu.memory_space<vmem>>) attributes {dimension_semantics = [], scalar_prefetch = 0 : i64, scratch_operands = 0 : i64, tpu.core_type = #tpu.core_type<tc>} {
    %c0 = arith.constant 0 : index
    %c0_0 = arith.constant 0 : index
    %0 = vector.load %arg0[%c0, %c0_0] : memref<16x32xf32, #tpu.memory_space<vmem>>, vector<16x32xf32>
    %c0_1 = arith.constant 0 : index
    %c0_2 = arith.constant 0 : index
    %c0_3 = arith.constant 0 : index
    %1 = vector.load %arg1[%c0_1, %c0_2, %c0_3] : memref<2x32x96xf32, #tpu.memory_space<vmem>>, vector<1x32x96xf32>
    %2 = vector.shape_cast %1 : vector<1x32x96xf32> to vector<32x96xf32>
    %c0_4 = arith.constant 0 : index
    %c0_5 = arith.constant 0 : index
    %c0_6 = arith.constant 0 : index
    %c0_7 = arith.constant 0 : index
    %3 = vector.load %arg2[%c0_4, %c0_5, %c0_6, %c0_7] : memref<2x4x8x32xf32, #tpu.memory_space<vmem>>, vector<1x4x8x32xf32>
    %4 = vector.shape_cast %3 : vector<1x4x8x32xf32> to vector<4x8x32xf32>
    %c0_8 = arith.constant 0 : index
    %c0_9 = arith.constant 0 : index
    %c0_10 = arith.constant 0 : index
    %5 = vector.load %arg3[%c0_8, %c0_9, %c0_10] : memref<2x32x64xf32, #tpu.memory_space<vmem>>, vector<1x32x64xf32>
    %6 = vector.shape_cast %5 : vector<1x32x64xf32> to vector<32x64xf32>
    %c0_11 = arith.constant 0 : index
    %c0_12 = arith.constant 0 : index
    %c0_13 = arith.constant 0 : index
    %7 = vector.load %arg4[%c0_11, %c0_12, %c0_13] : memref<2x64x32xf32, #tpu.memory_space<vmem>>, vector<1x64x32xf32>
    %8 = vector.shape_cast %7 : vector<1x64x32xf32> to vector<64x32xf32>
    %c0_14 = arith.constant 0 : index
    %c0_15 = arith.constant 0 : index
    %c0_16 = arith.constant 0 : index
    %9 = vector.load %arg5[%c0_14, %c0_15, %c0_16] : memref<2x8x128xf32, #tpu.memory_space<vmem>>, vector<1x8x128xf32>
    %10 = vector.shape_cast %9 : vector<1x8x128xf32> to vector<8x128xf32>
    %11 = vector.extract_strided_slice %10 {offsets = [0, 0], sizes = [1, 96], strides = [1, 1]} : vector<8x128xf32> to vector<1x96xf32>
    %12 = vector.extract_strided_slice %10 {offsets = [1, 0], sizes = [1, 32], strides = [1, 1]} : vector<8x128xf32> to vector<1x32xf32>
    %13 = vector.extract_strided_slice %10 {offsets = [2, 0], sizes = [1, 32], strides = [1, 1]} : vector<8x128xf32> to vector<1x32xf32>
    %14 = vector.extract_strided_slice %10 {offsets = [3, 0], sizes = [1, 32], strides = [1, 1]} : vector<8x128xf32> to vector<1x32xf32>
    %15 = vector.extract_strided_slice %10 {offsets = [4, 0], sizes = [1, 64], strides = [1, 1]} : vector<8x128xf32> to vector<1x64xf32>
    %16 = vector.extract_strided_slice %10 {offsets = [5, 0], sizes = [1, 32], strides = [1, 1]} : vector<8x128xf32> to vector<1x32xf32>
    %17 = vector.extract_strided_slice %10 {offsets = [6, 0], sizes = [1, 32], strides = [1, 1]} : vector<8x128xf32> to vector<1x32xf32>
    %18 = vector.extract_strided_slice %10 {offsets = [7, 0], sizes = [1, 32], strides = [1, 1]} : vector<8x128xf32> to vector<1x32xf32>
    %cst = arith.constant dense<0.000000e+00> : vector<16xf32>
    %19 = vector.multi_reduction <add>, %0, %cst [1] : vector<16x32xf32> to vector<16xf32>
    %20 = vector.shape_cast %19 : vector<16xf32> to vector<16x1xf32>
    %cst_17 = arith.constant 3.200000e+01 : f32
    %21 = vector.broadcast %cst_17 : f32 to vector<16x1xf32>
    %22 = arith.divf %20, %21 : vector<16x1xf32>
    %23 = arith.mulf %0, %0 : vector<16x32xf32>
    %cst_18 = arith.constant dense<0.000000e+00> : vector<16xf32>
    %24 = vector.multi_reduction <add>, %23, %cst_18 [1] : vector<16x32xf32> to vector<16xf32>
    %25 = vector.shape_cast %24 : vector<16xf32> to vector<16x1xf32>
    %cst_19 = arith.constant 3.200000e+01 : f32
    %26 = vector.broadcast %cst_19 : f32 to vector<16x1xf32>
    %27 = arith.divf %25, %26 : vector<16x1xf32>
    %28 = arith.mulf %22, %22 : vector<16x1xf32>
    %29 = arith.subf %27, %28 : vector<16x1xf32>
    %cst_20 = arith.constant 9.99999974E-6 : f32
    %30 = vector.broadcast %cst_20 : f32 to vector<16x1xf32>
    %31 = arith.addf %29, %30 : vector<16x1xf32>
    %32 = math.rsqrt %31 : vector<16x1xf32>
    %33 = vector.broadcast %32 : vector<16x1xf32> to vector<16x32xf32>
    %34 = vector.broadcast %13 : vector<1x32xf32> to vector<16x32xf32>
    %35 = arith.mulf %33, %34 : vector<16x32xf32>
    %36 = vector.broadcast %22 : vector<16x1xf32> to vector<16x32xf32>
    %37 = arith.subf %0, %36 : vector<16x32xf32>
    %38 = arith.mulf %37, %35 : vector<16x32xf32>
    %39 = vector.broadcast %14 : vector<1x32xf32> to vector<16x32xf32>
    %40 = arith.addf %38, %39 : vector<16x32xf32>
    %cst_21 = arith.constant dense<0.000000e+00> : vector<16x96xf32>
    %41 = tpu.matmul %40, %2, %cst_21 {dimension_numbers = #tpu.dot_dimension_numbers<[1], [0], [0], [1], [0, 0, 1, 1], [], []>} : vector<16x32xf32>, vector<32x96xf32>, vector<16x96xf32> -> vector<16x96xf32>
    %42 = vector.broadcast %11 : vector<1x96xf32> to vector<16x96xf32>
    %43 = arith.addf %41, %42 : vector<16x96xf32>
    %44 = vector.shape_cast %43 : vector<16x96xf32> to vector<2x8x96xf32>
    %45 = vector.extract_strided_slice %44 {offsets = [0, 0, 0], sizes = [2, 8, 8], strides = [1, 1, 1]} : vector<2x8x96xf32> to vector<2x8x8xf32>
    %46 = vector.extract_strided_slice %44 {offsets = [0, 0, 8], sizes = [2, 8, 8], strides = [1, 1, 1]} : vector<2x8x96xf32> to vector<2x8x8xf32>
    %47 = vector.extract_strided_slice %44 {offsets = [0, 0, 16], sizes = [2, 8, 8], strides = [1, 1, 1]} : vector<2x8x96xf32> to vector<2x8x8xf32>
    %48 = vector.extract_strided_slice %44 {offsets = [0, 0, 24], sizes = [2, 8, 8], strides = [1, 1, 1]} : vector<2x8x96xf32> to vector<2x8x8xf32>
    %49 = vector.extract_strided_slice %44 {offsets = [0, 0, 32], sizes = [2, 8, 8], strides = [1, 1, 1]} : vector<2x8x96xf32> to vector<2x8x8xf32>
    %50 = vector.extract_strided_slice %44 {offsets = [0, 0, 40], sizes = [2, 8, 8], strides = [1, 1, 1]} : vector<2x8x96xf32> to vector<2x8x8xf32>
    %51 = vector.extract_strided_slice %44 {offsets = [0, 0, 48], sizes = [2, 8, 8], strides = [1, 1, 1]} : vector<2x8x96xf32> to vector<2x8x8xf32>
    %52 = vector.extract_strided_slice %44 {offsets = [0, 0, 56], sizes = [2, 8, 8], strides = [1, 1, 1]} : vector<2x8x96xf32> to vector<2x8x8xf32>
    %53 = vector.extract_strided_slice %44 {offsets = [0, 0, 64], sizes = [2, 8, 8], strides = [1, 1, 1]} : vector<2x8x96xf32> to vector<2x8x8xf32>
    %54 = vector.extract_strided_slice %44 {offsets = [0, 0, 72], sizes = [2, 8, 8], strides = [1, 1, 1]} : vector<2x8x96xf32> to vector<2x8x8xf32>
    %55 = vector.extract_strided_slice %44 {offsets = [0, 0, 80], sizes = [2, 8, 8], strides = [1, 1, 1]} : vector<2x8x96xf32> to vector<2x8x8xf32>
    %56 = vector.extract_strided_slice %44 {offsets = [0, 0, 88], sizes = [2, 8, 8], strides = [1, 1, 1]} : vector<2x8x96xf32> to vector<2x8x8xf32>
    %57 = tpu.concatenate %45, %46, %47, %48, %49, %50, %51, %52, %53, %54, %55, %56 in 0 : vector<2x8x8xf32>, vector<2x8x8xf32>, vector<2x8x8xf32>, vector<2x8x8xf32>, vector<2x8x8xf32>, vector<2x8x8xf32>, vector<2x8x8xf32>, vector<2x8x8xf32>, vector<2x8x8xf32>, vector<2x8x8xf32>, vector<2x8x8xf32>, vector<2x8x8xf32> -> vector<24x8x8xf32>
    %58 = vector.extract_strided_slice %57 {offsets = [0, 0, 0], sizes = [8, 8, 8], strides = [1, 1, 1]} : vector<24x8x8xf32> to vector<8x8x8xf32>
    %59 = vector.extract_strided_slice %57 {offsets = [8, 0, 0], sizes = [8, 8, 8], strides = [1, 1, 1]} : vector<24x8x8xf32> to vector<8x8x8xf32>
    %60 = vector.extract_strided_slice %57 {offsets = [16, 0, 0], sizes = [8, 8, 8], strides = [1, 1, 1]} : vector<24x8x8xf32> to vector<8x8x8xf32>
    %cst_22 = arith.constant dense<0.000000e+00> : vector<8x8x8xf32>
    %61 = tpu.matmul %58, %59, %cst_22 {dimension_numbers = #tpu.dot_dimension_numbers<[2], [2], [1], [1], [0, 0, 0, 1, 1, 1], [0], [0]>} : vector<8x8x8xf32>, vector<8x8x8xf32>, vector<8x8x8xf32> -> vector<8x8x8xf32>
    %cst_23 = arith.constant dense<0xFF800000> : vector<8x8xf32>
    %62 = vector.multi_reduction <maximumf>, %61, %cst_23 [2] : vector<8x8x8xf32> to vector<8x8xf32>
    %63 = vector.shape_cast %62 : vector<8x8xf32> to vector<8x8x1xf32>
    %64 = vector.broadcast %63 : vector<8x8x1xf32> to vector<8x8x8xf32>
    %65 = arith.subf %61, %64 : vector<8x8x8xf32>
    %66 = math.exp %65 : vector<8x8x8xf32>
    %cst_24 = arith.constant dense<0.000000e+00> : vector<8x8xf32>
    %67 = vector.multi_reduction <add>, %66, %cst_24 [2] : vector<8x8x8xf32> to vector<8x8xf32>
    %68 = vector.shape_cast %67 : vector<8x8xf32> to vector<8x8x1xf32>
    %69 = vector.broadcast %68 : vector<8x8x1xf32> to vector<8x8x8xf32>
    %70 = arith.divf %66, %69 : vector<8x8x8xf32>
    %cst_25 = arith.constant dense<0.000000e+00> : vector<8x8x8xf32>
    %71 = tpu.matmul %70, %60, %cst_25 {dimension_numbers = #tpu.dot_dimension_numbers<[2], [1], [1], [2], [0, 0, 0, 1, 1, 2], [0], [0]>} : vector<8x8x8xf32>, vector<8x8x8xf32>, vector<8x8x8xf32> -> vector<8x8x8xf32>
    %72 = vector.shape_cast %71 : vector<8x8x8xf32> to vector<4x16x8xf32>
    %cst_26 = arith.constant dense<0.000000e+00> : vector<4x16x32xf32>
    %73 = tpu.matmul %72, %4, %cst_26 {dimension_numbers = #tpu.dot_dimension_numbers<[2], [1], [1], [2], [0, 0, 0, 1, 1, 2], [0], [0]>} : vector<4x16x8xf32>, vector<4x8x32xf32>, vector<4x16x32xf32> -> vector<4x16x32xf32>
    %cst_27 = arith.constant dense<0.000000e+00> : vector<16x32xf32>
    %74 = vector.multi_reduction <add>, %73, %cst_27 [0] : vector<4x16x32xf32> to vector<16x32xf32>
    %75 = vector.broadcast %12 : vector<1x32xf32> to vector<16x32xf32>
    %76 = arith.addf %74, %75 : vector<16x32xf32>
    %77 = arith.addf %0, %76 : vector<16x32xf32>
    %cst_28 = arith.constant dense<0.000000e+00> : vector<16xf32>
    %78 = vector.multi_reduction <add>, %77, %cst_28 [1] : vector<16x32xf32> to vector<16xf32>
    %79 = vector.shape_cast %78 : vector<16xf32> to vector<16x1xf32>
    %cst_29 = arith.constant 3.200000e+01 : f32
    %80 = vector.broadcast %cst_29 : f32 to vector<16x1xf32>
    %81 = arith.divf %79, %80 : vector<16x1xf32>
    %82 = arith.mulf %77, %77 : vector<16x32xf32>
    %cst_30 = arith.constant dense<0.000000e+00> : vector<16xf32>
    %83 = vector.multi_reduction <add>, %82, %cst_30 [1] : vector<16x32xf32> to vector<16xf32>
    %84 = vector.shape_cast %83 : vector<16xf32> to vector<16x1xf32>
    %cst_31 = arith.constant 3.200000e+01 : f32
    %85 = vector.broadcast %cst_31 : f32 to vector<16x1xf32>
    %86 = arith.divf %84, %85 : vector<16x1xf32>
    %87 = arith.mulf %81, %81 : vector<16x1xf32>
    %88 = arith.subf %86, %87 : vector<16x1xf32>
    %cst_32 = arith.constant 9.99999974E-6 : f32
    %89 = vector.broadcast %cst_32 : f32 to vector<16x1xf32>
    %90 = arith.addf %88, %89 : vector<16x1xf32>
    %91 = math.rsqrt %90 : vector<16x1xf32>
    %92 = vector.broadcast %91 : vector<16x1xf32> to vector<16x32xf32>
    %93 = vector.broadcast %17 : vector<1x32xf32> to vector<16x32xf32>
    %94 = arith.mulf %92, %93 : vector<16x32xf32>
    %95 = vector.broadcast %81 : vector<16x1xf32> to vector<16x32xf32>
    %96 = arith.subf %77, %95 : vector<16x32xf32>
    %97 = arith.mulf %96, %94 : vector<16x32xf32>
    %98 = vector.broadcast %18 : vector<1x32xf32> to vector<16x32xf32>
    %99 = arith.addf %97, %98 : vector<16x32xf32>
    %cst_33 = arith.constant dense<0.000000e+00> : vector<16x64xf32>
    %100 = tpu.matmul %99, %6, %cst_33 {dimension_numbers = #tpu.dot_dimension_numbers<[1], [0], [0], [1], [0, 0, 1, 1], [], []>} : vector<16x32xf32>, vector<32x64xf32>, vector<16x64xf32> -> vector<16x64xf32>
    %101 = vector.broadcast %15 : vector<1x64xf32> to vector<16x64xf32>
    %102 = arith.addf %100, %101 : vector<16x64xf32>
    %cst_34 = arith.constant 5.000000e-01 : f32
    %103 = vector.broadcast %cst_34 : f32 to vector<16x64xf32>
    %104 = arith.mulf %103, %102 : vector<16x64xf32>
    %cst_35 = arith.constant 0.707106769 : f32
    %105 = vector.broadcast %cst_35 : f32 to vector<16x64xf32>
    %106 = arith.mulf %102, %105 : vector<16x64xf32>
    %107 = math.absf %106 : vector<16x64xf32>
    %cst_36 = arith.constant 0.327591091 : f32
    %108 = vector.broadcast %cst_36 : f32 to vector<16x64xf32>
    %109 = arith.mulf %108, %107 : vector<16x64xf32>
    %cst_37 = arith.constant 1.000000e+00 : f32
    %110 = vector.broadcast %cst_37 : f32 to vector<16x64xf32>
    %111 = arith.addf %110, %109 : vector<16x64xf32>
    %cst_38 = arith.constant 1.000000e+00 : f32
    %112 = vector.broadcast %cst_38 : f32 to vector<16x64xf32>
    %113 = arith.divf %112, %111 : vector<16x64xf32>
    %cst_39 = arith.constant 1.06140542 : f32
    %114 = vector.broadcast %cst_39 : f32 to vector<16x64xf32>
    %115 = arith.mulf %113, %114 : vector<16x64xf32>
    %cst_40 = arith.constant -1.45315206 : f32
    %116 = vector.broadcast %cst_40 : f32 to vector<16x64xf32>
    %117 = arith.addf %116, %115 : vector<16x64xf32>
    %118 = arith.mulf %113, %117 : vector<16x64xf32>
    %cst_41 = arith.constant 1.42141378 : f32
    %119 = vector.broadcast %cst_41 : f32 to vector<16x64xf32>
    %120 = arith.addf %119, %118 : vector<16x64xf32>
    %121 = arith.mulf %113, %120 : vector<16x64xf32>
    %cst_42 = arith.constant -0.284496725 : f32
    %122 = vector.broadcast %cst_42 : f32 to vector<16x64xf32>
    %123 = arith.addf %122, %121 : vector<16x64xf32>
    %124 = arith.mulf %113, %123 : vector<16x64xf32>
    %cst_43 = arith.constant 0.254829586 : f32
    %125 = vector.broadcast %cst_43 : f32 to vector<16x64xf32>
    %126 = arith.addf %125, %124 : vector<16x64xf32>
    %127 = arith.mulf %113, %126 : vector<16x64xf32>
    %cst_44 = arith.constant 0.000000e+00 : f32
    %128 = vector.broadcast %cst_44 : f32 to vector<16x64xf32>
    %129 = arith.subf %128, %107 : vector<16x64xf32>
    %130 = arith.mulf %129, %107 : vector<16x64xf32>
    %131 = math.exp %130 : vector<16x64xf32>
    %132 = arith.mulf %127, %131 : vector<16x64xf32>
    %cst_45 = arith.constant 1.000000e+00 : f32
    %133 = vector.broadcast %cst_45 : f32 to vector<16x64xf32>
    %134 = arith.subf %133, %132 : vector<16x64xf32>
    %cst_46 = arith.constant 0.000000e+00 : f32
    %135 = vector.broadcast %cst_46 : f32 to vector<16x64xf32>
    %136 = arith.cmpf oge, %106, %135 : vector<16x64xf32>
    %cst_47 = arith.constant 0.000000e+00 : f32
    %137 = vector.broadcast %cst_47 : f32 to vector<16x64xf32>
    %138 = arith.subf %137, %134 : vector<16x64xf32>
    %139 = arith.select %136, %134, %138 : vector<16x64xi1>, vector<16x64xf32>
    %cst_48 = arith.constant 1.000000e+00 : f32
    %140 = vector.broadcast %cst_48 : f32 to vector<16x64xf32>
    %141 = arith.addf %140, %139 : vector<16x64xf32>
    %142 = arith.mulf %104, %141 : vector<16x64xf32>
    %cst_49 = arith.constant dense<0.000000e+00> : vector<16x32xf32>
    %143 = tpu.matmul %142, %8, %cst_49 {dimension_numbers = #tpu.dot_dimension_numbers<[1], [0], [0], [1], [0, 0, 1, 1], [], []>} : vector<16x64xf32>, vector<64x32xf32>, vector<16x32xf32> -> vector<16x32xf32>
    %144 = arith.addf %77, %143 : vector<16x32xf32>
    %145 = vector.broadcast %16 : vector<1x32xf32> to vector<16x32xf32>
    %146 = arith.addf %144, %145 : vector<16x32xf32>
    %c1 = arith.constant 1 : index
    %c0_50 = arith.constant 0 : index
    %c0_51 = arith.constant 0 : index
    %147 = vector.load %arg1[%c1, %c0_50, %c0_51] : memref<2x32x96xf32, #tpu.memory_space<vmem>>, vector<1x32x96xf32>
    %148 = vector.shape_cast %147 : vector<1x32x96xf32> to vector<32x96xf32>
    %c1_52 = arith.constant 1 : index
    %c0_53 = arith.constant 0 : index
    %c0_54 = arith.constant 0 : index
    %c0_55 = arith.constant 0 : index
    %149 = vector.load %arg2[%c1_52, %c0_53, %c0_54, %c0_55] : memref<2x4x8x32xf32, #tpu.memory_space<vmem>>, vector<1x4x8x32xf32>
    %150 = vector.shape_cast %149 : vector<1x4x8x32xf32> to vector<4x8x32xf32>
    %c1_56 = arith.constant 1 : index
    %c0_57 = arith.constant 0 : index
    %c0_58 = arith.constant 0 : index
    %151 = vector.load %arg3[%c1_56, %c0_57, %c0_58] : memref<2x32x64xf32, #tpu.memory_space<vmem>>, vector<1x32x64xf32>
    %152 = vector.shape_cast %151 : vector<1x32x64xf32> to vector<32x64xf32>
    %c1_59 = arith.constant 1 : index
    %c0_60 = arith.constant 0 : index
    %c0_61 = arith.constant 0 : index
    %153 = vector.load %arg4[%c1_59, %c0_60, %c0_61] : memref<2x64x32xf32, #tpu.memory_space<vmem>>, vector<1x64x32xf32>
    %154 = vector.shape_cast %153 : vector<1x64x32xf32> to vector<64x32xf32>
    %c1_62 = arith.constant 1 : index
    %c0_63 = arith.constant 0 : index
    %c0_64 = arith.constant 0 : index
    %155 = vector.load %arg5[%c1_62, %c0_63, %c0_64] : memref<2x8x128xf32, #tpu.memory_space<vmem>>, vector<1x8x128xf32>
    %156 = vector.shape_cast %155 : vector<1x8x128xf32> to vector<8x128xf32>
    %157 = vector.extract_strided_slice %156 {offsets = [0, 0], sizes = [1, 96], strides = [1, 1]} : vector<8x128xf32> to vector<1x96xf32>
    %158 = vector.extract_strided_slice %156 {offsets = [1, 0], sizes = [1, 32], strides = [1, 1]} : vector<8x128xf32> to vector<1x32xf32>
    %159 = vector.extract_strided_slice %156 {offsets = [2, 0], sizes = [1, 32], strides = [1, 1]} : vector<8x128xf32> to vector<1x32xf32>
    %160 = vector.extract_strided_slice %156 {offsets = [3, 0], sizes = [1, 32], strides = [1, 1]} : vector<8x128xf32> to vector<1x32xf32>
    %161 = vector.extract_strided_slice %156 {offsets = [4, 0], sizes = [1, 64], strides = [1, 1]} : vector<8x128xf32> to vector<1x64xf32>
    %162 = vector.extract_strided_slice %156 {offsets = [5, 0], sizes = [1, 32], strides = [1, 1]} : vector<8x128xf32> to vector<1x32xf32>
    %163 = vector.extract_strided_slice %156 {offsets = [6, 0], sizes = [1, 32], strides = [1, 1]} : vector<8x128xf32> to vector<1x32xf32>
    %164 = vector.extract_strided_slice %156 {offsets = [7, 0], sizes = [1, 32], strides = [1, 1]} : vector<8x128xf32> to vector<1x32xf32>
    %cst_65 = arith.constant dense<0.000000e+00> : vector<16xf32>
    %165 = vector.multi_reduction <add>, %146, %cst_65 [1] : vector<16x32xf32> to vector<16xf32>
    %166 = vector.shape_cast %165 : vector<16xf32> to vector<16x1xf32>
    %cst_66 = arith.constant 3.200000e+01 : f32
    %167 = vector.broadcast %cst_66 : f32 to vector<16x1xf32>
    %168 = arith.divf %166, %167 : vector<16x1xf32>
    %169 = arith.mulf %146, %146 : vector<16x32xf32>
    %cst_67 = arith.constant dense<0.000000e+00> : vector<16xf32>
    %170 = vector.multi_reduction <add>, %169, %cst_67 [1] : vector<16x32xf32> to vector<16xf32>
    %171 = vector.shape_cast %170 : vector<16xf32> to vector<16x1xf32>
    %cst_68 = arith.constant 3.200000e+01 : f32
    %172 = vector.broadcast %cst_68 : f32 to vector<16x1xf32>
    %173 = arith.divf %171, %172 : vector<16x1xf32>
    %174 = arith.mulf %168, %168 : vector<16x1xf32>
    %175 = arith.subf %173, %174 : vector<16x1xf32>
    %cst_69 = arith.constant 9.99999974E-6 : f32
    %176 = vector.broadcast %cst_69 : f32 to vector<16x1xf32>
    %177 = arith.addf %175, %176 : vector<16x1xf32>
    %178 = math.rsqrt %177 : vector<16x1xf32>
    %179 = vector.broadcast %178 : vector<16x1xf32> to vector<16x32xf32>
    %180 = vector.broadcast %159 : vector<1x32xf32> to vector<16x32xf32>
    %181 = arith.mulf %179, %180 : vector<16x32xf32>
    %182 = vector.broadcast %168 : vector<16x1xf32> to vector<16x32xf32>
    %183 = arith.subf %146, %182 : vector<16x32xf32>
    %184 = arith.mulf %183, %181 : vector<16x32xf32>
    %185 = vector.broadcast %160 : vector<1x32xf32> to vector<16x32xf32>
    %186 = arith.addf %184, %185 : vector<16x32xf32>
    %cst_70 = arith.constant dense<0.000000e+00> : vector<16x96xf32>
    %187 = tpu.matmul %186, %148, %cst_70 {dimension_numbers = #tpu.dot_dimension_numbers<[1], [0], [0], [1], [0, 0, 1, 1], [], []>} : vector<16x32xf32>, vector<32x96xf32>, vector<16x96xf32> -> vector<16x96xf32>
    %188 = vector.broadcast %157 : vector<1x96xf32> to vector<16x96xf32>
    %189 = arith.addf %187, %188 : vector<16x96xf32>
    %190 = vector.shape_cast %189 : vector<16x96xf32> to vector<2x8x96xf32>
    %191 = vector.extract_strided_slice %190 {offsets = [0, 0, 0], sizes = [2, 8, 8], strides = [1, 1, 1]} : vector<2x8x96xf32> to vector<2x8x8xf32>
    %192 = vector.extract_strided_slice %190 {offsets = [0, 0, 8], sizes = [2, 8, 8], strides = [1, 1, 1]} : vector<2x8x96xf32> to vector<2x8x8xf32>
    %193 = vector.extract_strided_slice %190 {offsets = [0, 0, 16], sizes = [2, 8, 8], strides = [1, 1, 1]} : vector<2x8x96xf32> to vector<2x8x8xf32>
    %194 = vector.extract_strided_slice %190 {offsets = [0, 0, 24], sizes = [2, 8, 8], strides = [1, 1, 1]} : vector<2x8x96xf32> to vector<2x8x8xf32>
    %195 = vector.extract_strided_slice %190 {offsets = [0, 0, 32], sizes = [2, 8, 8], strides = [1, 1, 1]} : vector<2x8x96xf32> to vector<2x8x8xf32>
    %196 = vector.extract_strided_slice %190 {offsets = [0, 0, 40], sizes = [2, 8, 8], strides = [1, 1, 1]} : vector<2x8x96xf32> to vector<2x8x8xf32>
    %197 = vector.extract_strided_slice %190 {offsets = [0, 0, 48], sizes = [2, 8, 8], strides = [1, 1, 1]} : vector<2x8x96xf32> to vector<2x8x8xf32>
    %198 = vector.extract_strided_slice %190 {offsets = [0, 0, 56], sizes = [2, 8, 8], strides = [1, 1, 1]} : vector<2x8x96xf32> to vector<2x8x8xf32>
    %199 = vector.extract_strided_slice %190 {offsets = [0, 0, 64], sizes = [2, 8, 8], strides = [1, 1, 1]} : vector<2x8x96xf32> to vector<2x8x8xf32>
    %200 = vector.extract_strided_slice %190 {offsets = [0, 0, 72], sizes = [2, 8, 8], strides = [1, 1, 1]} : vector<2x8x96xf32> to vector<2x8x8xf32>
    %201 = vector.extract_strided_slice %190 {offsets = [0, 0, 80], sizes = [2, 8, 8], strides = [1, 1, 1]} : vector<2x8x96xf32> to vector<2x8x8xf32>
    %202 = vector.extract_strided_slice %190 {offsets = [0, 0, 88], sizes = [2, 8, 8], strides = [1, 1, 1]} : vector<2x8x96xf32> to vector<2x8x8xf32>
    %203 = tpu.concatenate %191, %192, %193, %194, %195, %196, %197, %198, %199, %200, %201, %202 in 0 : vector<2x8x8xf32>, vector<2x8x8xf32>, vector<2x8x8xf32>, vector<2x8x8xf32>, vector<2x8x8xf32>, vector<2x8x8xf32>, vector<2x8x8xf32>, vector<2x8x8xf32>, vector<2x8x8xf32>, vector<2x8x8xf32>, vector<2x8x8xf32>, vector<2x8x8xf32> -> vector<24x8x8xf32>
    %204 = vector.extract_strided_slice %203 {offsets = [0, 0, 0], sizes = [8, 8, 8], strides = [1, 1, 1]} : vector<24x8x8xf32> to vector<8x8x8xf32>
    %205 = vector.extract_strided_slice %203 {offsets = [8, 0, 0], sizes = [8, 8, 8], strides = [1, 1, 1]} : vector<24x8x8xf32> to vector<8x8x8xf32>
    %206 = vector.extract_strided_slice %203 {offsets = [16, 0, 0], sizes = [8, 8, 8], strides = [1, 1, 1]} : vector<24x8x8xf32> to vector<8x8x8xf32>
    %cst_71 = arith.constant dense<0.000000e+00> : vector<8x8x8xf32>
    %207 = tpu.matmul %204, %205, %cst_71 {dimension_numbers = #tpu.dot_dimension_numbers<[2], [2], [1], [1], [0, 0, 0, 1, 1, 1], [0], [0]>} : vector<8x8x8xf32>, vector<8x8x8xf32>, vector<8x8x8xf32> -> vector<8x8x8xf32>
    %cst_72 = arith.constant dense<0xFF800000> : vector<8x8xf32>
    %208 = vector.multi_reduction <maximumf>, %207, %cst_72 [2] : vector<8x8x8xf32> to vector<8x8xf32>
    %209 = vector.shape_cast %208 : vector<8x8xf32> to vector<8x8x1xf32>
    %210 = vector.broadcast %209 : vector<8x8x1xf32> to vector<8x8x8xf32>
    %211 = arith.subf %207, %210 : vector<8x8x8xf32>
    %212 = math.exp %211 : vector<8x8x8xf32>
    %cst_73 = arith.constant dense<0.000000e+00> : vector<8x8xf32>
    %213 = vector.multi_reduction <add>, %212, %cst_73 [2] : vector<8x8x8xf32> to vector<8x8xf32>
    %214 = vector.shape_cast %213 : vector<8x8xf32> to vector<8x8x1xf32>
    %215 = vector.broadcast %214 : vector<8x8x1xf32> to vector<8x8x8xf32>
    %216 = arith.divf %212, %215 : vector<8x8x8xf32>
    %cst_74 = arith.constant dense<0.000000e+00> : vector<8x8x8xf32>
    %217 = tpu.matmul %216, %206, %cst_74 {dimension_numbers = #tpu.dot_dimension_numbers<[2], [1], [1], [2], [0, 0, 0, 1, 1, 2], [0], [0]>} : vector<8x8x8xf32>, vector<8x8x8xf32>, vector<8x8x8xf32> -> vector<8x8x8xf32>
    %218 = vector.shape_cast %217 : vector<8x8x8xf32> to vector<4x16x8xf32>
    %cst_75 = arith.constant dense<0.000000e+00> : vector<4x16x32xf32>
    %219 = tpu.matmul %218, %150, %cst_75 {dimension_numbers = #tpu.dot_dimension_numbers<[2], [1], [1], [2], [0, 0, 0, 1, 1, 2], [0], [0]>} : vector<4x16x8xf32>, vector<4x8x32xf32>, vector<4x16x32xf32> -> vector<4x16x32xf32>
    %cst_76 = arith.constant dense<0.000000e+00> : vector<16x32xf32>
    %220 = vector.multi_reduction <add>, %219, %cst_76 [0] : vector<4x16x32xf32> to vector<16x32xf32>
    %221 = vector.broadcast %158 : vector<1x32xf32> to vector<16x32xf32>
    %222 = arith.addf %220, %221 : vector<16x32xf32>
    %223 = arith.addf %146, %222 : vector<16x32xf32>
    %cst_77 = arith.constant dense<0.000000e+00> : vector<16xf32>
    %224 = vector.multi_reduction <add>, %223, %cst_77 [1] : vector<16x32xf32> to vector<16xf32>
    %225 = vector.shape_cast %224 : vector<16xf32> to vector<16x1xf32>
    %cst_78 = arith.constant 3.200000e+01 : f32
    %226 = vector.broadcast %cst_78 : f32 to vector<16x1xf32>
    %227 = arith.divf %225, %226 : vector<16x1xf32>
    %228 = arith.mulf %223, %223 : vector<16x32xf32>
    %cst_79 = arith.constant dense<0.000000e+00> : vector<16xf32>
    %229 = vector.multi_reduction <add>, %228, %cst_79 [1] : vector<16x32xf32> to vector<16xf32>
    %230 = vector.shape_cast %229 : vector<16xf32> to vector<16x1xf32>
    %cst_80 = arith.constant 3.200000e+01 : f32
    %231 = vector.broadcast %cst_80 : f32 to vector<16x1xf32>
    %232 = arith.divf %230, %231 : vector<16x1xf32>
    %233 = arith.mulf %227, %227 : vector<16x1xf32>
    %234 = arith.subf %232, %233 : vector<16x1xf32>
    %cst_81 = arith.constant 9.99999974E-6 : f32
    %235 = vector.broadcast %cst_81 : f32 to vector<16x1xf32>
    %236 = arith.addf %234, %235 : vector<16x1xf32>
    %237 = math.rsqrt %236 : vector<16x1xf32>
    %238 = vector.broadcast %237 : vector<16x1xf32> to vector<16x32xf32>
    %239 = vector.broadcast %163 : vector<1x32xf32> to vector<16x32xf32>
    %240 = arith.mulf %238, %239 : vector<16x32xf32>
    %241 = vector.broadcast %227 : vector<16x1xf32> to vector<16x32xf32>
    %242 = arith.subf %223, %241 : vector<16x32xf32>
    %243 = arith.mulf %242, %240 : vector<16x32xf32>
    %244 = vector.broadcast %164 : vector<1x32xf32> to vector<16x32xf32>
    %245 = arith.addf %243, %244 : vector<16x32xf32>
    %cst_82 = arith.constant dense<0.000000e+00> : vector<16x64xf32>
    %246 = tpu.matmul %245, %152, %cst_82 {dimension_numbers = #tpu.dot_dimension_numbers<[1], [0], [0], [1], [0, 0, 1, 1], [], []>} : vector<16x32xf32>, vector<32x64xf32>, vector<16x64xf32> -> vector<16x64xf32>
    %247 = vector.broadcast %161 : vector<1x64xf32> to vector<16x64xf32>
    %248 = arith.addf %246, %247 : vector<16x64xf32>
    %cst_83 = arith.constant 5.000000e-01 : f32
    %249 = vector.broadcast %cst_83 : f32 to vector<16x64xf32>
    %250 = arith.mulf %249, %248 : vector<16x64xf32>
    %cst_84 = arith.constant 0.707106769 : f32
    %251 = vector.broadcast %cst_84 : f32 to vector<16x64xf32>
    %252 = arith.mulf %248, %251 : vector<16x64xf32>
    %253 = math.absf %252 : vector<16x64xf32>
    %cst_85 = arith.constant 0.327591091 : f32
    %254 = vector.broadcast %cst_85 : f32 to vector<16x64xf32>
    %255 = arith.mulf %254, %253 : vector<16x64xf32>
    %cst_86 = arith.constant 1.000000e+00 : f32
    %256 = vector.broadcast %cst_86 : f32 to vector<16x64xf32>
    %257 = arith.addf %256, %255 : vector<16x64xf32>
    %cst_87 = arith.constant 1.000000e+00 : f32
    %258 = vector.broadcast %cst_87 : f32 to vector<16x64xf32>
    %259 = arith.divf %258, %257 : vector<16x64xf32>
    %cst_88 = arith.constant 1.06140542 : f32
    %260 = vector.broadcast %cst_88 : f32 to vector<16x64xf32>
    %261 = arith.mulf %259, %260 : vector<16x64xf32>
    %cst_89 = arith.constant -1.45315206 : f32
    %262 = vector.broadcast %cst_89 : f32 to vector<16x64xf32>
    %263 = arith.addf %262, %261 : vector<16x64xf32>
    %264 = arith.mulf %259, %263 : vector<16x64xf32>
    %cst_90 = arith.constant 1.42141378 : f32
    %265 = vector.broadcast %cst_90 : f32 to vector<16x64xf32>
    %266 = arith.addf %265, %264 : vector<16x64xf32>
    %267 = arith.mulf %259, %266 : vector<16x64xf32>
    %cst_91 = arith.constant -0.284496725 : f32
    %268 = vector.broadcast %cst_91 : f32 to vector<16x64xf32>
    %269 = arith.addf %268, %267 : vector<16x64xf32>
    %270 = arith.mulf %259, %269 : vector<16x64xf32>
    %cst_92 = arith.constant 0.254829586 : f32
    %271 = vector.broadcast %cst_92 : f32 to vector<16x64xf32>
    %272 = arith.addf %271, %270 : vector<16x64xf32>
    %273 = arith.mulf %259, %272 : vector<16x64xf32>
    %cst_93 = arith.constant 0.000000e+00 : f32
    %274 = vector.broadcast %cst_93 : f32 to vector<16x64xf32>
    %275 = arith.subf %274, %253 : vector<16x64xf32>
    %276 = arith.mulf %275, %253 : vector<16x64xf32>
    %277 = math.exp %276 : vector<16x64xf32>
    %278 = arith.mulf %273, %277 : vector<16x64xf32>
    %cst_94 = arith.constant 1.000000e+00 : f32
    %279 = vector.broadcast %cst_94 : f32 to vector<16x64xf32>
    %280 = arith.subf %279, %278 : vector<16x64xf32>
    %cst_95 = arith.constant 0.000000e+00 : f32
    %281 = vector.broadcast %cst_95 : f32 to vector<16x64xf32>
    %282 = arith.cmpf oge, %252, %281 : vector<16x64xf32>
    %cst_96 = arith.constant 0.000000e+00 : f32
    %283 = vector.broadcast %cst_96 : f32 to vector<16x64xf32>
    %284 = arith.subf %283, %280 : vector<16x64xf32>
    %285 = arith.select %282, %280, %284 : vector<16x64xi1>, vector<16x64xf32>
    %cst_97 = arith.constant 1.000000e+00 : f32
    %286 = vector.broadcast %cst_97 : f32 to vector<16x64xf32>
    %287 = arith.addf %286, %285 : vector<16x64xf32>
    %288 = arith.mulf %250, %287 : vector<16x64xf32>
    %cst_98 = arith.constant dense<0.000000e+00> : vector<16x32xf32>
    %289 = tpu.matmul %288, %154, %cst_98 {dimension_numbers = #tpu.dot_dimension_numbers<[1], [0], [0], [1], [0, 0, 1, 1], [], []>} : vector<16x64xf32>, vector<64x32xf32>, vector<16x32xf32> -> vector<16x32xf32>
    %290 = arith.addf %223, %289 : vector<16x32xf32>
    %291 = vector.broadcast %162 : vector<1x32xf32> to vector<16x32xf32>
    %292 = arith.addf %290, %291 : vector<16x32xf32>
    %c0_99 = arith.constant 0 : index
    %c0_100 = arith.constant 0 : index
    %293 = vector.load %arg6[%c0_99, %c0_100] : memref<16x32xf32, #tpu.memory_space<vmem>>, vector<16x32xf32>
    tpu.vector_store %arg6[%c0_99, %c0_100], %292 {strides = array<i32>} : memref<16x32xf32, #tpu.memory_space<vmem>>, vector<16x32xf32>,
    return
  }
}

</mosaic_0001>

<bundles_post_ra>
// kernel: tpu_custom_call.1
= control target key start
LH: loop header
LB: loop body
LE: loop exit
PB: predicated region body
PF: predicated region fallthrough
CT: control target
= control target key end

     0   :  { %11 = vsyncpa [#allocation3], 0  ;;  %s3189_s0 = inlined_call_operand.hbm [shape: f32[16,32], index: 0, kind: input, shape index: {}]   ;;  %s3190_s1 = inlined_call_operand.vmem [shape: f32[2,32,96], index: 1, kind: input, shape index: {}]   ;;  %s3191_s2 = inlined_call_operand.vmem [shape: f32[2,4,8,32], index: 2, kind: input, shape index: {}]   ;;  %s3192_s3 = inlined_call_operand.vmem [shape: f32[2,32,64], index: 3, kind: input, shape index: {}]   ;;  %s3193_s4 = inlined_call_operand.vmem [shape: f32[2,64,32], index: 4, kind: input, shape index: {}]   ;;  %s3194_s5 = inlined_call_operand.hbm [shape: f32[2,8,128], index: 5, kind: input, shape index: {}]   ;;  %s3195_s6 = inlined_call_operand.hbm [shape: f32[16,32], index: 6, kind: output, shape index: {}]  }
   0x1   :  { %12 = vsyncpa [#allocation6], 0 }
   0x2   :  { %13 = vsyncpa [#allocation4], 0  ;;  %s18_s23 = sshll.u32 %s3189_s0, 4  ;;  %s2526_s24 = smov [#allocation2]   ;;  %s19_s23 = int_to_ptr.hbm [resolvable:$true] %s18_s23 }
   0x3   :  { %s20_s25 = sshll.u32 %s2526_s24, 4  ;;  %s39_s28 = sshll.u32 %s3194_s5, 4  ;;  %s21_s25 = int_to_ptr.vmem [resolvable:$true] %s20_s25  ;;  %s40_s28 = int_to_ptr.hbm [resolvable:$true] %s39_s28 }
   0x4   :  { %s2527_s29 = smov 128   ;;  %s2528_s30 = smov 8  }
   0x5   :  { %26 = dma.hbm_to_vmem [thread:$0]  %s19_s23, 256, %s21_s25, [#allocation3], %s2527_s29, %s2527_s29, %s2528_s30  }
   0x6   :  { %s2529_s7 = smov [#allocation5]  }
   0x7   :  { %s41_s8 = sshll.u32 %s2529_s7, 4  ;;  %s42_s8 = int_to_ptr.vmem [resolvable:$true] %s41_s8 }
   0x8   :  { %47 = dma.hbm_to_vmem [thread:$0]  %s40_s28, 256, %s42_s8, [#allocation6], %s2527_s29, %s2527_s29, %s2528_s30  }
   0x9   :  { %2520 = dma.done.wait [#allocation3], 256  }
   0xa   :  { %2521 = vsyncadd [#allocation3], 4294967040 }
   0xb   :  { %2522 = dma.done.wait [#allocation6], 256  }
   0xc   :  { %2523 = vsyncadd [#allocation6], 4294967040  ;;  %vm79_vm0 = vcmask 261120   ;;  %v2590_v0 = vld [vmem:[#allocation2 + $0x8] sm:$0xff]  ;;  %v2592_v1 = vld [vmem:[#allocation2] sm:$0xff]  ;;  %v2530_v8 = vmov 32.0  }
   0xd   :  { %v83_v2 = vsel %vm79_vm0, %v2590_v0, 0.0  ;;  %v80_v3 = vsel %vm79_vm0, %v2592_v1, 0.0  ;;  %v96_v4 = vmul.f32 %v2590_v0, %v2590_v0  ;;  %v95_v5 = vmul.f32 %v2592_v1, %v2592_v1  ;;  %v61_v14 = vld [vmem:[%s3190_s1 + $0x18] sm:$0xff]  ;;  %v60_v15 = vld [vmem:[%s3190_s1 + $0x10] sm:$0xff]  ;;  %v59_v18 = vld [vmem:[%s3190_s1 + $0x8] sm:$0xff]  ;;  %s2531_s15 = smov 120  }
   0xe   :  { %84 = vadd.xlane.f32.xlu1 %v83_v2  ;;  %81 = vadd.xlane.f32.xlu0 %v80_v3  ;;  %2348 = vrcp.f32 %v2530_v8  ;;  %v58_v21 = vld [vmem:[%s3190_s1] sm:$0xff]  ;;  %v2622_v41 = vld [vmem:[#allocation5] sm:$0xff]  ;;  %s2532_s16 = smov 80   ;;  %s2533_s17 = smov 96   ;;  %vm225_vm8 = vcmask 64512  }
   0xf   :  { %v100_v6 = vsel %vm79_vm0, %v96_v4, 0.0  ;;  %v97_v7 = vsel %vm79_vm0, %v95_v5, 0.0  ;;  %160 = vmatpush.msra.mxu0 %v61_v14  ;;  %v131_v44 = vperm.slane %v2622_v41, 2  ;;  %v138_v50 = vperm.slane %v2622_v41, 3  ;;  %s2534_s18 = smov 72   ;;  %s2535_s19 = smov 88  }
  0x10   :  { %v141_v58 = vperm.slane %v2622_v41, 0  ;;  %s2536_s20 = smov 104   ;;  %s2537_s21 = smov 112  }
  0x11   :  { %161 = vmatpush.msra.mxu0 %v60_v15  ;;  %s2538_s22 = smov 64   ;;  %s2539_s23 = smov 56  }
  0x12   :  { %s2540_s24 = smov 40   ;;  %s2541_s25 = smov 48  }
  0x13   :  { %162 = vmatpush.msra.mxu0 %v59_v18 }
  0x14   :  { %v2349_v9 = vpop.eup %2348 }
  0x15   :  { %v87_v10 = vmul.f32 32.0, %v2349_v9  ;;  %vm91_vm1 = vweird.f32 %v2349_v9  ;;  %163 = vmatpush.msra.mxu0 %v58_v21 }
  0x16   :  { %101 = vadd.xlane.f32.xlu1 %v100_v6  ;;  %98 = vadd.xlane.f32.xlu0 %v97_v7 }
  0x17   :  { %v88_v11 = vsub.f32 1.0, %v87_v10 }
  0x19   :  { %v89_v12 = vmul.f32 %v2349_v9, %v88_v11 }
  0x1b   :  { %v90_v13 = vadd.f32 %v2349_v9, %v89_v12 }
  0x1d   :  { %v2613_v19 = vsel %vm91_vm1, %v2349_v9, %v90_v13 }
  0x81   :  { %v85_v16 = vpop.xlane.xlu1 %84  ;;  %v82_v17 = vpop.xlane.xlu0 %81 }
  0x82   :  { %v94_v20 = vmul.f32 %v2613_v19, %v85_v16  ;;  %v93_v22 = vmul.f32 %v2613_v19, %v82_v17 }
  0x84   :  { %v106_v23 = vmul.f32 %v94_v20, %v94_v20  ;;  %v105_v26 = vmul.f32 %v93_v22, %v93_v22  ;;  %v134_v48 = vsub.f32 %v2592_v1, %v93_v22  ;;  %v135_v55 = vsub.f32 %v2590_v0, %v94_v20 }
  0x89   :  { %v102_v24 = vpop.xlane.xlu1 %101  ;;  %v99_v25 = vpop.xlane.xlu0 %98 }
  0x8a   :  { %v104_v27 = vmul.f32 %v102_v24, %v2613_v19  ;;  %v103_v28 = vmul.f32 %v99_v25, %v2613_v19 }
  0x8c   :  { %v108_v29 = vsub.f32 %v104_v27, %v106_v23  ;;  %v107_v30 = vsub.f32 %v103_v28, %v105_v26 }
  0x8e   :  { %v110_v31 = vadd.f32 1e-05, %v108_v29  ;;  %v109_v32 = vadd.f32 1e-05, %v107_v30 }
  0x90   :  { %2350 = vrsqrt.f32 %v110_v31  ;;  %vm127_vm3 = vweird.f32 %v110_v31  ;;  %vm117_vm5 = vweird.f32 %v109_v32 }
  0x91   :  { %2352 = vrsqrt.f32 %v109_v32 }
  0x96   :  { %v2351_v33 = vpop.eup %2350 }
  0x97   :  { %v2353_v34 = vpop.eup %2352  ;;  %v122_v35 = vmul.f32 %v2351_v33, %v110_v31  ;;  %vm128_vm4 = vweird.f32 %v2351_v33 }
  0x98   :  { %v112_v36 = vmul.f32 %v2353_v34, %v109_v32  ;;  %vm118_vm2 = vweird.f32 %v2353_v34  ;;  %vm129_vm7 = vmor %vm127_vm3, %vm128_vm4 }
  0x99   :  { %v123_v37 = vmul.f32 %v2351_v33, %v122_v35  ;;  %vm119_vm6 = vmor %vm117_vm5, %vm118_vm2 }
  0x9a   :  { %v113_v38 = vmul.f32 %v2353_v34, %v112_v36 }
  0x9b   :  { %v124_v39 = vmul.f32 0.5, %v123_v37 }
  0x9c   :  { %v114_v40 = vmul.f32 0.5, %v113_v38 }
  0x9d   :  { %v125_v42 = vsub.f32 1.5, %v124_v39 }
  0x9e   :  { %v115_v43 = vsub.f32 1.5, %v114_v40 }
  0x9f   :  { %v126_v45 = vmul.f32 %v2351_v33, %v125_v42 }
  0xa0   :  { %v116_v46 = vmul.f32 %v2353_v34, %v115_v43 }
  0xa1   :  { %v130_v51 = vsel %vm129_vm7, %v2351_v33, %v126_v45 }
  0xa2   :  { %v120_v47 = vsel %vm119_vm6, %v2353_v34, %v116_v46  ;;  %v133_v54 = vmul.f32 %v131_v44, %v130_v51 }
  0xa3   :  { %v132_v49 = vmul.f32 %v131_v44, %v120_v47 }
  0xa4   :  { %v137_v56 = vmul.f32 %v135_v55, %v133_v54 }
  0xa5   :  { %v136_v52 = vmul.f32 %v134_v48, %v132_v49 }
  0xa6   :  { %v140_v57 = vadd.f32 %v138_v50, %v137_v56 }
  0xa7   :  { %v139_v53 = vadd.f32 %v138_v50, %v136_v52 }
  0xa9   :  { %2215 = vmatmul.msk.f32.vlgmr.msra.gmra.mxu0 %vm79_vm0, %v139_v53 }
  0xb1   :  { %2216 = vmatmul.msk.f32.gmra.mxu0 %vm79_vm0, %v140_v57 }
 0x126   :  { %v165_v59 = vpop.f32.mrf.mxu0 }
 0x127   :  { %v2631_v60 = vadd.f32 %v165_v59, %v141_v58 }
 0x129   :  { %173 = vrot.lane.b32.xlu1 %v2631_v60, %s2531_s15  ;;  %193 = vrot.lane.b32.xlu0 %v2631_v60, %s2532_s16 }
 0x12a   :  { %185 = vrot.lane.b32.xlu2 %v2631_v60, %s2533_s17 }
 0x12e   :  { %v168_v61 = vpop.f32.mrf.mxu0 }
 0x12f   :  { %v2639_v62 = vadd.f32 %v168_v61, %v141_v58 }
 0x131   :  { %197 = vrot.lane.b32.xlu1 %v2631_v60, %s2534_s18  ;;  %199 = vrot.lane.b32.xlu0 %v2639_v62, %s2534_s18  ;;  %v2328_v32 = vpack.i.bf16 %v2639_v62, %v2631_v60 }
 0x132   :  { %189 = vrot.lane.b32.xlu2 %v2631_v60, %s2535_s19 }
 0x139   :  { %195 = vrot.lane.b32.xlu1 %v2639_v62, %s2532_s16  ;;  %181 = vrot.lane.b32.xlu0 %v2631_v60, %s2536_s20 }
 0x13a   :  { %177 = vrot.lane.b32.xlu2 %v2631_v60, %s2537_s21 }
 0x141   :  { %179 = vrot.lane.b32.xlu0 %v2639_v62, %s2537_s21 }
 0x142   :  { %191 = vrot.lane.b32.xlu2 %v2639_v62, %s2535_s19 }
 0x14a   :  { %175 = vrot.lane.b32.xlu2 %v2639_v62, %s2531_s15 }
 0x152   :  { %183 = vrot.lane.b32.xlu2 %v2639_v62, %s2536_s20 }
 0x15a   :  { %187 = vrot.lane.b32.xlu2 %v2639_v62, %s2533_s17 }
 0x184   :  { %v186_v63 = vpop.permute.xlu2 %185 }
 0x185   :  { %2217 = vmatpush.xpose.msk.msra.mxu3 %vm225_vm8, %v186_v63 }
 0x188   :  { %2218 = vmatmul.msk.f32.vlgmr.msra.gmra.mxu3 %vm225_vm8, %v2631_v60 }
 0x18c   :  { %v190_v2 = vpop.permute.xlu2 %189 }
 0x18d   :  { %2221 = vmatpush.xpose.msk.msrb.mxu3 %vm225_vm8, %v190_v2 }
 0x194   :  { %v178_v3 = vpop.permute.xlu2 %177 }
 0x19b   :  { %v174_v4 = vpop.permute.xlu1 %173  ;;  %v194_v5 = vpop.permute.xlu0 %193 }
 0x19c   :  { %v192_v6 = vpop.permute.xlu2 %191  ;;  %2222 = vmatmul.msk.f32.vlgmr.msrb.gmra.mxu3 %vm225_vm8, %v174_v4  ;;  %2225 = vmatpush.xpose.msk.msra.mxu2 %vm225_vm8, %v194_v5 }
 0x19d   :  { %2223 = vmatpush.xpose.msk.msra.mxu1 %vm225_vm8, %v192_v6 }
 0x19f   :  { %2226 = vmatmul.msk.f32.vlgmr.msra.gmra.mxu2 %vm225_vm8, %v178_v3 }
 0x1a3   :  { %v198_v7 = vpop.permute.xlu1 %197  ;;  %v200_v8 = vpop.permute.xlu0 %199 }
 0x1a4   :  { %v176_v9 = vpop.permute.xlu2 %175  ;;  %2229 = vmatpush.xpose.msk.msrb.mxu1 %vm225_vm8, %v198_v7  ;;  %2231 = vmatpush.xpose.msk.msrb.mxu2 %vm225_vm8, %v200_v8 }
 0x1a5   :  { %2224 = vmatmul.msk.f32.vlgmr.msra.gmra.mxu1 %vm225_vm8, %v176_v9 }
 0x1ab   :  { %v196_v10 = vpop.permute.xlu1 %195  ;;  %v182_v11 = vpop.permute.xlu0 %181 }
 0x1ac   :  { %v184_v12 = vpop.permute.xlu2 %183  ;;  %2227 = vmatpush.xpose.msk.msra.mxu3 %vm225_vm8, %v196_v10 }
 0x1ad   :  { %2230 = vmatmul.msk.f32.vlgmr.msrb.gmra.mxu1 %vm225_vm8, %v182_v11  ;;  %2232 = vmatmul.msk.f32.vlgmr.msrb.gmra.mxu2 %vm225_vm8, %v184_v12 }
 0x1b3   :  { %v180_v13 = vpop.permute.xlu0 %179 }
 0x1b4   :  { %v188_v14 = vpop.permute.xlu2 %187  ;;  %2228 = vmatmul.msk.f32.vlgmr.msra.gmra.mxu3 %vm225_vm8, %v180_v13 }
 0x1b5   :  { %2219 = vmatpush.xpose.msk.msrb.mxu0 %vm225_vm8, %v188_v14 }
 0x1b8   :  { %2220 = vmatmul.msk.f32.vlgmr.msrb.gmra.mxu0 %vm225_vm8, %v2639_v62 }
 0x20b   :  { %v247_v15 = vpop.f32.mrf.mxu3 }
 0x20c   :  { %v418_v16 = vsel %vm225_vm8, %v247_v15, -inf }
 0x20d   :  { %419 = vmax.xlane.f32.xlu2 %v418_v16 }
 0x21f   :  { %v295_v17 = vpop.f32.mrf.mxu3 }
 0x220   :  { %v424_v18 = vsel %vm225_vm8, %v295_v17, -inf }
 0x221   :  { %425 = vmax.xlane.f32.xlu1 %v424_v18 }
 0x222   :  { %v319_v20 = vpop.f32.mrf.mxu1  ;;  %v343_v21 = vpop.f32.mrf.mxu2 }
 0x223   :  { %v427_v22 = vsel %vm225_vm8, %v319_v20, -inf  ;;  %v430_v23 = vsel %vm225_vm8, %v343_v21, -inf }
 0x224   :  { %428 = vmax.xlane.f32.xlu0 %v427_v22  ;;  %431 = vmax.xlane.f32.xlu2 %v430_v23 }
 0x22a   :  { %v391_v24 = vpop.f32.mrf.mxu1 }
 0x22b   :  { %v436_v25 = vsel %vm225_vm8, %v391_v24, -inf }
 0x22c   :  { %437 = vmax.xlane.f32.xlu1 %v436_v25 }
 0x230   :  { %v415_v26 = vpop.f32.mrf.mxu2 }
 0x231   :  { %v439_v27 = vsel %vm225_vm8, %v415_v26, -inf }
 0x232   :  { %440 = vmax.xlane.f32.xlu0 %v439_v27 }
 0x235   :  { %v271_v28 = vpop.f32.mrf.mxu0 }
 0x236   :  { %v421_v29 = vsel %vm225_vm8, %v271_v28, -inf }
 0x237   :  { %422 = vmax.xlane.f32.xlu2 %v421_v29  ;;  %v367_v30 = vpop.f32.mrf.mxu3 }
 0x238   :  { %v433_v31 = vsel %vm225_vm8, %v367_v30, -inf }
 0x239   :  { %434 = vmax.xlane.f32.xlu1 %v433_v31 }
 0x24f   :  { %201 = vrot.lane.b32.xlu2 %v2631_v60, %s2538_s22 }
 0x252   :  { %2329 = vrot.lane.b32.xlu1 %v2328_v32, %s2539_s23 }
 0x280   :  { %v420_v33 = vpop.xlane.xlu2 %419 }
 0x281   :  { %v442_v34 = vsub.f32 %v247_v15, %v420_v33 }
 0x283   :  { %v450_v35 = vmul.f32 1.442695, %v442_v34 }
 0x285   :  { %2354 = vpow2.f32 %v450_v35 }
 0x28b   :  { %v2694_v36 = vpop.eup %2354 }
 0x28c   :  { %v466_v37 = vsel %vm225_vm8, %v2694_v36, 0.0 }
 0x28d   :  { %467 = vadd.xlane.f32.xlu0 %v466_v37 }
 0x294   :  { %v426_v38 = vpop.xlane.xlu1 %425 }
 0x295   :  { %v444_v39 = vsub.f32 %v295_v17, %v426_v38 }
 0x297   :  { %v454_v40 = vmul.f32 1.442695, %v444_v39  ;;  %v429_v42 = vpop.xlane.xlu0 %428  ;;  %v432_v43 = vpop.xlane.xlu2 %431 }
 0x298   :  { %v445_v44 = vsub.f32 %v319_v20, %v429_v42  ;;  %v446_v45 = vsub.f32 %v343_v21, %v432_v43 }
 0x299   :  { %2356 = vpow2.f32 %v454_v40 }
 0x29a   :  { %v456_v46 = vmul.f32 1.442695, %v445_v44  ;;  %v458_v47 = vmul.f32 1.442695, %v446_v45 }
 0x29c   :  { %2358 = vpow2.f32 %v456_v46 }
 0x29d   :  { %2360 = vpow2.f32 %v458_v47 }
 0x29f   :  { %v2698_v48 = vpop.eup %2356  ;;  %v438_v49 = vpop.xlane.xlu1 %437 }
 0x2a0   :  { %v448_v50 = vsub.f32 %v391_v24, %v438_v49  ;;  %v472_v51 = vsel %vm225_vm8, %v2698_v48, 0.0 }
 0x2a1   :  { %473 = vadd.xlane.f32.xlu2 %v472_v51 }
 0x2a2   :  { %v2702_v52 = vpop.eup %2358  ;;  %v462_v53 = vmul.f32 1.442695, %v448_v50 }
 0x2a3   :  { %v2704_v54 = vpop.eup %2360  ;;  %v475_v55 = vsel %vm225_vm8, %v2702_v52, 0.0 }
 0x2a4   :  { %2362 = vpow2.f32 %v462_v53  ;;  %476 = vadd.xlane.f32.xlu1 %v475_v55  ;;  %v478_v56 = vsel %vm225_vm8, %v2704_v54, 0.0 }
 0x2a5   :  { %v441_v57 = vpop.xlane.xlu0 %440  ;;  %479 = vadd.xlane.f32.xlu0 %v478_v56 }
 0x2a6   :  { %v449_v58 = vsub.f32 %v415_v26, %v441_v57 }
 0x2a8   :  { %v464_v59 = vmul.f32 1.442695, %v449_v58 }
 0x2aa   :  { %v2710_v61 = vpop.eup %2362  ;;  %2364 = vpow2.f32 %v464_v59  ;;  %v423_v63 = vpop.xlane.xlu2 %422 }
 0x2ab   :  { %v443_v2 = vsub.f32 %v271_v28, %v423_v63  ;;  %v484_v3 = vsel %vm225_vm8, %v2710_v61, 0.0 }
 0x2ac   :  { %485 = vadd.xlane.f32.xlu2 %v484_v3  ;;  %v435_v4 = vpop.xlane.xlu1 %434 }
 0x2ad   :  { %v452_v5 = vmul.f32 1.442695, %v443_v2  ;;  %v447_v6 = vsub.f32 %v367_v30, %v435_v4 }
 0x2af   :  { %2366 = vpow2.f32 %v452_v5  ;;  %v460_v8 = vmul.f32 1.442695, %v447_v6 }
 0x2b0   :  { %v2714_v7 = vpop.eup %2364 }
 0x2b1   :  { %v487_v9 = vsel %vm225_vm8, %v2714_v7, 0.0  ;;  %2368 = vpow2.f32 %v460_v8 }
 0x2b2   :  { %488 = vadd.xlane.f32.xlu1 %v487_v9  ;;  %v202_v10 = vpop.permute.xlu2 %201 }
 0x2b3   :  { %628 = vmatpush.msrb.mxu3 %v202_v10 }
 0x2b5   :  { %v2718_v11 = vpop.eup %2366 }
 0x2b6   :  { %v469_v12 = vsel %vm225_vm8, %v2718_v11, 0.0 }
 0x2b7   :  { %470 = vadd.xlane.f32.xlu0 %v469_v12  ;;  %v2722_v13 = vpop.eup %2368 }
 0x2b8   :  { %v481_v14 = vsel %vm225_vm8, %v2722_v13, 0.0 }
 0x2bf   :  { %482 = vadd.xlane.f32.xlu0 %v481_v14 }
 0x2c4   :  { %2334 = vrot.lane.b32.xlu2 %v2328_v32, %s2540_s24  ;;  %v2330_v15 = vpop.permute.xlu1 %2329 }
 0x2c5   :  { %v2332_v16 = vunpack.i.h.bf16 %v2330_v15  ;;  %v2331_v17 = vunpack.i.l.bf16 %v2330_v15 }
 0x2c7   :  { %674 = vmatpush.msra.mxu1 %v2331_v17  ;;  %697 = vmatpush.msra.mxu2 %v2332_v16 }
 0x2cb   :  { %203 = vrot.lane.b32.xlu1 %v2639_v62, %s2538_s22 }
 0x2cc   :  { %215 = vrot.lane.b32.xlu2 %v2639_v62, %s2541_s25 }
 0x2d3   :  { %213 = vrot.lane.b32.xlu0 %v2631_v60, %s2541_s25 }
 0x300   :  { %v468_v18 = vpop.xlane.xlu0 %467 }
 0x301   :  { %2370 = vrcp.f32 %v468_v18  ;;  %v501_v23 = vand.u32 2147483648, %v468_v18  ;;  %v499_v25 = vand.u32 2147483647, %v468_v18  ;;  %vm495_vm10 = vweird.f32 %v468_v18 }
 0x303   :  { %v502_v27 = vor.u32 1.1754944e-38, %v501_v23  ;;  %vm500_vm12 = vcmp.eq.f32.partialorder %v499_v25, 8.507059e+37 }
 0x307   :  { %v2371_v20 = vpop.eup %2370 }
 0x308   :  { %v491_v21 = vmul.f32 %v2371_v20, %v468_v18  ;;  %vm496_vm9 = vweird.f32 %v2371_v20 }
 0x309   :  { %vm497_vm11 = vmor %vm495_vm10, %vm496_vm9 }
 0x30a   :  { %v492_v22 = vsub.f32 1.0, %v491_v21 }
 0x30c   :  { %v493_v24 = vmul.f32 %v2371_v20, %v492_v22 }
 0x30e   :  { %v494_v26 = vadd.f32 %v2371_v20, %v493_v24 }
 0x310   :  { %v498_v28 = vsel %vm497_vm11, %v2371_v20, %v494_v26 }
 0x311   :  { %v503_v29 = vsel %vm500_vm12, %v502_v27, %v498_v28 }
 0x312   :  { %v504_v62 = vmul.f32 %v2694_v36, %v503_v29 }
 0x314   :  { %2233 = vmatmul.msk.f32.vlgmr.msrb.gmra.mxu3 %vm225_vm8, %v504_v62  ;;  %v474_v60 = vpop.xlane.xlu2 %473 }
 0x315   :  { %2372 = vrcp.f32 %v474_v60  ;;  %v531_v39 = vand.u32 2147483648, %v474_v60  ;;  %vm525_vm14 = vweird.f32 %v474_v60  ;;  %v529_v36 = vand.u32 2147483647, %v474_v60 }
 0x317   :  { %v477_v30 = vpop.xlane.xlu1 %476  ;;  %v532_v50 = vor.u32 1.1754944e-38, %v531_v39  ;;  %vm530_vm3 = vcmp.eq.f32.partialorder %v529_v36, 8.507059e+37 }
 0x318   :  { %2374 = vrcp.f32 %v477_v30  ;;  %v546_v43 = vand.u32 2147483648, %v477_v30  ;;  %v2735_v44 = vpop.xlane.xlu0 %479  ;;  %v544_v47 = vand.u32 2147483647, %v477_v30  ;;  %vm540_vm2 = vweird.f32 %v477_v30 }
 0x31a   :  { %v547_v56 = vor.u32 1.1754944e-38, %v546_v43  ;;  %vm545_vm5 = vcmp.eq.f32.partialorder %v544_v47, 8.507059e+37  ;;  %v561_v47 = vand.u32 2147483648, %v2735_v44 }
 0x31b   :  { %v2373_v31 = vpop.eup %2372 }
 0x31c   :  { %v521_v32 = vmul.f32 %v2373_v31, %v474_v60  ;;  %vm526_vm13 = vweird.f32 %v2373_v31 }
 0x31d   :  { %vm2737_vm15 = vmor %vm525_vm14, %vm526_vm13 }
 0x31e   :  { %v2375_v33 = vpop.eup %2374  ;;  %v522_v34 = vsub.f32 1.0, %v521_v32 }
 0x31f   :  { %v536_v35 = vmul.f32 %v2375_v33, %v477_v30  ;;  %v486_v37 = vpop.xlane.xlu2 %485  ;;  %vm541_vm1 = vweird.f32 %v2375_v33 }
 0x320   :  { %v523_v38 = vmul.f32 %v2373_v31, %v522_v34  ;;  %2376 = vrcp.f32 %v486_v37  ;;  %vm542_vm4 = vmor %vm540_vm2, %vm541_vm1  ;;  %v591_v6 = vand.u32 2147483648, %v486_v37  ;;  %v589_v15 = vand.u32 2147483647, %v486_v37 }
 0x321   :  { %v537_v40 = vsub.f32 1.0, %v536_v35  ;;  %2378 = vrcp.f32 %v2735_v44  ;;  %vm585_vm7 = vweird.f32 %v486_v37 }
 0x322   :  { %v524_v42 = vadd.f32 %v2373_v31, %v523_v38  ;;  %vm590_vm10 = vcmp.eq.f32.partialorder %v589_v15, 8.507059e+37 }
 0x323   :  { %v538_v46 = vmul.f32 %v2375_v33, %v537_v40 }
 0x324   :  { %v528_v49 = vsel %vm2737_vm15, %v2373_v31, %v524_v42 }
 0x325   :  { %v539_v51 = vadd.f32 %v2375_v33, %v538_v46  ;;  %v489_v53 = vpop.xlane.xlu1 %488  ;;  %v533_v57 = vsel %vm530_vm3, %v532_v50, %v528_v49  ;;  %v559_v50 = vand.u32 2147483647, %v2735_v44 }
 0x326   :  { %v2377_v55 = vpop.eup %2376  ;;  %2380 = vrcp.f32 %v489_v53  ;;  %v534_v8 = vmul.f32 %v2698_v48, %v533_v57  ;;  %v592_v48 = vor.u32 1.1754944e-38, %v591_v6  ;;  %v606_v23 = vand.u32 2147483648, %v489_v53 }
 0x327   :  { %v543_v58 = vsel %vm542_vm4, %v2375_v33, %v539_v51  ;;  %v581_v59 = vmul.f32 %v2377_v55, %v486_v37  ;;  %v2335_v63 = vpop.permute.xlu2 %2334  ;;  %v2746_v12 = vpop.eup %2378  ;;  %vm586_vm6 = vweird.f32 %v2377_v55  ;;  %v604_v26 = vand.u32 2147483647, %v489_v53 }
 0x328   :  { %v548_v2 = vsel %vm545_vm5, %v547_v56, %v543_v58  ;;  %v2337_v3 = vunpack.i.h.bf16 %v2335_v63  ;;  %v2336_v5 = vunpack.i.l.bf16 %v2335_v63  ;;  %2235 = vmatmul.msk.f32.vlgmr.msra.gmra.mxu1 %vm225_vm8, %v534_v8  ;;  %vm587_vm9 = vmor %vm585_vm7, %vm586_vm6  ;;  %vm600_vm12 = vweird.f32 %v489_v53 }
 0x329   :  { %v582_v4 = vsub.f32 1.0, %v581_v59  ;;  %v549_v10 = vmul.f32 %v2702_v52, %v548_v2  ;;  %v551_v52 = vmul.f32 %v2746_v12, %v2735_v44  ;;  %v607_v30 = vor.u32 1.1754944e-38, %v606_v23 }
 0x32a   :  { %v471_v9 = vpop.xlane.xlu0 %470  ;;  %789 = vmatpush.msrb.mxu2 %v2337_v3  ;;  %766 = vmatpush.msrb.mxu1 %v2336_v5  ;;  %vm605_vm14 = vcmp.eq.f32.partialorder %v604_v26, 8.507059e+37  ;;  %vm556_vm4 = vweird.f32 %v2746_v12  ;;  %vm555_vm5 = vweird.f32 %v2735_v44 }
 0x32b   :  { %v583_v14 = vmul.f32 %v2377_v55, %v582_v4  ;;  %2382 = vrcp.f32 %v471_v9  ;;  %2236 = vmatmul.msk.f32.vlgmr.msra.gmra.mxu2 %vm225_vm8, %v549_v10  ;;  %v552_v62 = vsub.f32 1.0, %v551_v52  ;;  %v516_v33 = vand.u32 2147483648, %v471_v9  ;;  %vm2763_vm6 = vmor %vm555_vm5, %vm556_vm4  ;;  %v63_v10 = vld [vmem:[%s3191_s2 + $0x8] sm:$0xff] }
 0x32c   :  { %v2381_v16 = vpop.eup %2380  ;;  %v514_v37 = vand.u32 2147483647, %v471_v9  ;;  %vm510_vm1 = vweird.f32 %v471_v9 }
 0x32d   :  { %v584_v17 = vadd.f32 %v2377_v55, %v583_v14  ;;  %v596_v18 = vmul.f32 %v2381_v16, %v489_v53  ;;  %vm601_vm11 = vweird.f32 %v2381_v16  ;;  %v517_v42 = vor.u32 1.1754944e-38, %v516_v33  ;;  %v64_v14 = vld [vmem:[%s3191_s2 + $0x10] sm:$0xff] }
 0x32e   :  { %vm602_vm13 = vmor %vm600_vm12, %vm601_vm11  ;;  %vm515_vm3 = vcmp.eq.f32.partialorder %v514_v37, 8.507059e+37  ;;  %873 = vmatpush.msra.mxu1 %v64_v14 }
 0x32f   :  { %v588_v20 = vsel %vm587_vm9, %v2377_v55, %v584_v17  ;;  %v597_v21 = vsub.f32 1.0, %v596_v18  ;;  %v216_v59 = vpop.permute.xlu2 %215  ;;  %v67_v55 = vld [vmem:[%s3192_s3 + $0x8] sm:$0xff] }
 0x330   :  { %v593_v22 = vsel %vm590_vm10, %v592_v48, %v588_v20  ;;  %vm560_vm10 = vcmp.eq.f32.partialorder %v559_v50, 8.507059e+37 }
 0x331   :  { %v2383_v24 = vpop.eup %2382  ;;  %v598_v25 = vmul.f32 %v2381_v16, %v597_v21  ;;  %v594_v27 = vmul.f32 %v2710_v61, %v593_v22  ;;  %v553_v61 = vmul.f32 %v2746_v12, %v552_v62  ;;  %v924_v62 = vperm.slane %v2622_v41, 1 }
 0x332   :  { %v506_v28 = vmul.f32 %v2383_v24, %v471_v9  ;;  %v483_v29 = vpop.xlane.xlu0 %482  ;;  %vm511_vm15 = vweird.f32 %v2383_v24  ;;  %v62_v9 = vld [vmem:[%s3191_s2] sm:$0xff] }
 0x333   :  { %v599_v60 = vadd.f32 %v2381_v16, %v598_v25  ;;  %2384 = vrcp.f32 %v483_v29  ;;  %2239 = vmatmul.msk.f32.vlgmr.msrb.gmra.mxu1 %vm225_vm8, %v594_v27  ;;  %vm512_vm2 = vmor %vm510_vm1, %vm511_vm15  ;;  %v554_v45 = vadd.f32 %v2746_v12, %v553_v61  ;;  %v576_v51 = vand.u32 2147483648, %v483_v29 }
 0x334   :  { %v507_v31 = vsub.f32 1.0, %v506_v28  ;;  %v574_v57 = vand.u32 2147483647, %v483_v29  ;;  %vm570_vm9 = vweird.f32 %v483_v29 }
 0x335   :  { %v603_v32 = vsel %vm602_vm13, %v2381_v16, %v599_v60  ;;  %v558_v58 = vsel %vm2763_vm6, %v2746_v12, %v554_v45  ;;  %v577_v44 = vor.u32 1.1754944e-38, %v576_v51  ;;  %v69_v51 = vld [vmem:[%s3192_s3 + $0x18] sm:$0xff] }
 0x336   :  { %v608_v34 = vsel %vm605_vm14, %v607_v30, %v603_v32  ;;  %v508_v35 = vmul.f32 %v2383_v24, %v507_v31  ;;  %vm575_vm12 = vcmp.eq.f32.partialorder %v574_v57, 8.507059e+37 }
 0x337   :  { %v609_v38 = vmul.f32 %v2714_v7, %v608_v34 }
 0x338   :  { %v509_v39 = vadd.f32 %v2383_v24, %v508_v35 }
 0x339   :  { %v2385_v40 = vpop.eup %2384  ;;  %2240 = vmatmul.msk.f32.vlgmr.msrb.gmra.mxu2 %vm225_vm8, %v609_v38 }
 0x33a   :  { %v513_v36 = vsel %vm512_vm2, %v2383_v24, %v509_v39  ;;  %v566_v43 = vmul.f32 %v2385_v40, %v483_v29  ;;  %vm571_vm7 = vweird.f32 %v2385_v40 }
 0x33b   :  { %v518_v46 = vsel %vm515_vm3, %v517_v42, %v513_v36  ;;  %vm572_vm11 = vmor %vm570_vm9, %vm571_vm7 }
 0x33c   :  { %v567_v49 = vsub.f32 1.0, %v566_v43  ;;  %v519_v7 = vmul.f32 %v2718_v11, %v518_v46  ;;  %v562_v11 = vor.u32 1.1754944e-38, %v561_v47 }
 0x33d   :  { %v204_v53 = vpop.permute.xlu1 %203 }
 0x33e   :  { %v568_v56 = vmul.f32 %v2385_v40, %v567_v49  ;;  %651 = vmatpush.msra.mxu0 %v204_v53  ;;  %v563_v2 = vsel %vm560_vm10, %v562_v11, %v558_v58 }
 0x33f   :  { %2234 = vmatmul.msk.f32.vlgmr.msra.gmra.mxu0 %vm225_vm8, %v519_v7  ;;  %v564_v8 = vmul.f32 %v2704_v54, %v563_v2 }
 0x340   :  { %v569_v63 = vadd.f32 %v2385_v40, %v568_v56  ;;  %743 = vmatpush.msrb.mxu0 %v216_v59  ;;  %v66_v56 = vld [vmem:[%s3192_s3] sm:$0xff] }
 0x342   :  { %v573_v3 = vsel %vm572_vm11, %v2385_v40, %v569_v63  ;;  %844 = vmatpush.msra.mxu0 %v63_v10 }
 0x343   :  { %v578_v4 = vsel %vm575_vm12, %v577_v44, %v573_v3 }
 0x344   :  { %v579_v5 = vmul.f32 %v2722_v13, %v578_v4  ;;  %v65_v13 = vld [vmem:[%s3191_s2 + $0x18] sm:$0xff] }
 0x345   :  { %v214_v6 = vpop.permute.xlu0 %213  ;;  %902 = vmatpush.msra.mxu2 %v65_v13 }
 0x346   :  { %720 = vmatpush.msra.mxu3 %v214_v6 }
 0x347   :  { %2237 = vmatmul.msk.f32.vlgmr.msra.gmra.mxu3 %vm225_vm8, %v564_v8  ;;  %2238 = vmatmul.msk.f32.vlgmr.msrb.gmra.mxu0 %vm225_vm8, %v579_v5 }
 0x348   :  { %815 = vmatpush.msrb.mxu3 %v62_v9 }
 0x34a   :  { %1002 = vmatpush.msra.mxu3 %v69_v51 }
 0x397   :  { %v630_v54 = vpop.f32.mrf.mxu3 }
 0x398   :  { %2241 = vmatmul.msk.f32.vlgmr.msrb.gmra.mxu3 %vm225_vm8, %v630_v54 }
 0x3a5   :  { %v676_v12 = vpop.f32.mrf.mxu1 }
 0x3a6   :  { %2243 = vmatmul.msk.f32.vlgmr.msra.gmra.mxu0 %vm225_vm8, %v676_v12 }
 0x3ae   :  { %v699_v15 = vpop.f32.mrf.mxu2 }
 0x3af   :  { %2244 = vmatmul.msk.f32.gmra.mxu0 %vm225_vm8, %v699_v15 }
 0x3b0   :  { %v768_v16 = vpop.f32.mrf.mxu1 }
 0x3b1   :  { %2247 = vmatmul.msk.f32.vlgmr.msra.gmra.mxu2 %vm225_vm8, %v768_v16  ;;  %v973_v16 = vperm.slane %v2622_v41, 6 }
 0x3bc   :  { %v653_v17 = vpop.f32.mrf.mxu0  ;;  %v791_v18 = vpop.f32.mrf.mxu2 }
 0x3bd   :  { %2242 = vmatmul.msk.f32.gmra.mxu3 %vm225_vm8, %v653_v17  ;;  %2248 = vmatmul.msk.f32.gmra.mxu2 %vm225_vm8, %v791_v18 }
 0x3c4   :  { %v745_v52 = vpop.f32.mrf.mxu0 }
 0x3ca   :  { %v722_v48 = vpop.f32.mrf.mxu3 }
 0x3cb   :  { %2245 = vmatmul.msk.f32.vlgmr.msra.gmra.mxu1 %vm225_vm8, %v722_v48 }
 0x3d3   :  { %2246 = vmatmul.msk.f32.gmra.mxu1 %vm225_vm8, %v745_v52 }
 0x41b   :  { %v817_v20 = vpop.f32.mrf.mxu3 }
 0x41c   :  { %v910_v23 = vsel %vm79_vm0, %v817_v20, 0.0 }
 0x423   :  { %v846_v21 = vpop.f32.mrf.mxu0 }
 0x424   :  { %v911_v22 = vsel %vm79_vm0, %v846_v21, 0.0 }
 0x425   :  { %v912_v24 = vadd.f32 %v911_v22, %v910_v23  ;;  %v980_v22 = vperm.slane %v2622_v41, 7 }
 0x42c   :  { %v849_v30 = vpop.f32.mrf.mxu0 }
 0x42d   :  { %v918_v34 = vsel %vm79_vm0, %v849_v30, 0.0 }
 0x434   :  { %v904_v25 = vpop.f32.mrf.mxu2 }
 0x435   :  { %v915_v60 = vsel %vm79_vm0, %v904_v25, 0.0 }
 0x440   :  { %v820_v28 = vpop.f32.mrf.mxu3  ;;  %v907_v37 = vpop.f32.mrf.mxu2 }
 0x441   :  { %v917_v32 = vsel %vm79_vm0, %v820_v28, 0.0  ;;  %v922_v43 = vsel %vm79_vm0, %v907_v37, 0.0 }
 0x442   :  { %v919_v35 = vadd.f32 %v918_v34, %v917_v32 }
 0x448   :  { %v875_v26 = vpop.f32.mrf.mxu1 }
 0x449   :  { %v913_v27 = vsel %vm79_vm0, %v875_v26, 0.0 }
 0x44a   :  { %v914_v29 = vadd.f32 %v913_v27, %v912_v24 }
 0x44c   :  { %v916_v31 = vadd.f32 %v915_v60, %v914_v29 }
 0x44e   :  { %v925_v33 = vadd.f32 %v924_v62, %v916_v31  ;;  %v983_v31 = vperm.slane %v2622_v41, 4  ;;  %v77_v41 = vld [vmem:[%s3193_s4 + $0x38] sm:$0xff] }
 0x44f   :  { %1108 = vmatpush.msrb.mxu0 %v77_v41 }
 0x450   :  { %v2803_v61 = vadd.f32 %v925_v33, %v2592_v1  ;;  %v878_v38 = vpop.f32.mrf.mxu1 }
 0x451   :  { %v920_v39 = vsel %vm79_vm0, %v878_v38, 0.0 }
 0x452   :  { %v921_v40 = vadd.f32 %v920_v39, %v919_v35  ;;  %v929_v42 = vsel %vm79_vm0, %v2803_v61, 0.0  ;;  %v937_v36 = vmul.f32 %v2803_v61, %v2803_v61 }
 0x453   :  { %930 = vadd.xlane.f32.xlu0 %v929_v42 }
 0x454   :  { %v923_v45 = vadd.f32 %v922_v43, %v921_v40  ;;  %v939_v46 = vsel %vm79_vm0, %v937_v36, 0.0  ;;  %v76_v43 = vld [vmem:[%s3193_s4 + $0x30] sm:$0xff] }
 0x455   :  { %940 = vadd.xlane.f32.xlu1 %v939_v46  ;;  %1109 = vmatpush.msrb.mxu0 %v76_v43  ;;  %v75_v46 = vld [vmem:[%s3193_s4 + $0x28] sm:$0xff] }
 0x456   :  { %v926_v47 = vadd.f32 %v924_v62, %v923_v45 }
 0x457   :  { %1110 = vmatpush.msrb.mxu0 %v75_v46 }
 0x458   :  { %v2813_v1 = vadd.f32 %v926_v47, %v2590_v0  ;;  %v68_v0 = vld [vmem:[%s3192_s3 + $0x10] sm:$0xff] }
 0x459   :  { %1003 = vmatpush.msra.mxu3 %v68_v0  ;;  %v73_v0 = vld [vmem:[%s3193_s4 + $0x18] sm:$0xff] }
 0x45a   :  { %v932_v49 = vsel %vm79_vm0, %v2813_v1, 0.0  ;;  %v938_v7 = vmul.f32 %v2813_v1, %v2813_v1 }
 0x45b   :  { %933 = vadd.xlane.f32.xlu2 %v932_v49  ;;  %1004 = vmatpush.msra.mxu3 %v67_v55 }
 0x45c   :  { %v942_v50 = vsel %vm79_vm0, %v938_v7, 0.0 }
 0x45d   :  { %943 = vadd.xlane.f32.xlu0 %v942_v50  ;;  %1005 = vmatpush.msra.mxu3 %v66_v56  ;;  %v74_v50 = vld [vmem:[%s3193_s4 + $0x20] sm:$0xff] }
 0x45e   :  { %1111 = vmatpush.msrb.mxu0 %v74_v50 }
 0x460   :  { %1112 = vmatpush.msrb.mxu0 %v73_v0 }
 0x4c6   :  { %v931_v53 = vpop.xlane.xlu0 %930 }
 0x4c7   :  { %v935_v57 = vmul.f32 %v931_v53, %v2613_v19 }
 0x4c8   :  { %v941_v58 = vpop.xlane.xlu1 %940 }
 0x4c9   :  { %v947_v59 = vmul.f32 %v935_v57, %v935_v57  ;;  %v945_v11 = vmul.f32 %v941_v58, %v2613_v19  ;;  %v976_v20 = vsub.f32 %v2803_v61, %v935_v57  ;;  %v72_v57 = vld [vmem:[%s3193_s4 + $0x10] sm:$0xff]  ;;  %v71_v58 = vld [vmem:[%s3193_s4 + $0x8] sm:$0xff] }
 0x4ca   :  { %1113 = vmatpush.msrb.mxu0 %v72_v57 }
 0x4cb   :  { %v949_v63 = vsub.f32 %v945_v11, %v947_v59  ;;  %v70_v11 = vld [vmem:[%s3193_s4] sm:$0xff] }
 0x4cc   :  { %1114 = vmatpush.msrb.mxu0 %v71_v58 }
 0x4cd   :  { %v951_v44 = vadd.f32 1e-05, %v949_v63 }
 0x4ce   :  { %v934_v2 = vpop.xlane.xlu2 %933  ;;  %1115 = vmatpush.msrb.mxu0 %v70_v11 }
 0x4cf   :  { %2386 = vrsqrt.f32 %v951_v44  ;;  %v936_v3 = vmul.f32 %v934_v2, %v2613_v19  ;;  %vm959_vm14 = vweird.f32 %v951_v44 }
 0x4d0   :  { %v944_v4 = vpop.xlane.xlu0 %943 }
 0x4d1   :  { %v948_v5 = vmul.f32 %v936_v3, %v936_v3  ;;  %v946_v6 = vmul.f32 %v944_v4, %v2613_v19  ;;  %v977_v29 = vsub.f32 %v2813_v1, %v936_v3 }
 0x4d3   :  { %v950_v8 = vsub.f32 %v946_v6, %v948_v5 }
 0x4d5   :  { %v2387_v9 = vpop.eup %2386  ;;  %v952_v10 = vadd.f32 1e-05, %v950_v8 }
 0x4d6   :  { %v954_v13 = vmul.f32 %v2387_v9, %v951_v44  ;;  %vm960_vm13 = vweird.f32 %v2387_v9 }
 0x4d7   :  { %2388 = vrsqrt.f32 %v952_v10  ;;  %vm961_vm15 = vmor %vm959_vm14, %vm960_vm13  ;;  %vm969_vm2 = vweird.f32 %v952_v10  ;;  %vm1093_vm14 = vcmask 523264  }
 0x4d8   :  { %v955_v54 = vmul.f32 %v2387_v9, %v954_v13 }
 0x4da   :  { %v956_v12 = vmul.f32 0.5, %v955_v54 }
 0x4dc   :  { %v957_v14 = vsub.f32 1.5, %v956_v12 }
 0x4dd   :  { %v2389_v15 = vpop.eup %2388 }
 0x4de   :  { %v958_v17 = vmul.f32 %v2387_v9, %v957_v14  ;;  %v964_v18 = vmul.f32 %v2389_v15, %v952_v10  ;;  %vm970_vm1 = vweird.f32 %v2389_v15 }
 0x4df   :  { %vm971_vm3 = vmor %vm969_vm2, %vm970_vm1 }
 0x4e0   :  { %v962_v48 = vsel %vm961_vm15, %v2387_v9, %v958_v17  ;;  %v965_v52 = vmul.f32 %v2389_v15, %v964_v18 }
 0x4e1   :  { %v974_v21 = vmul.f32 %v973_v16, %v962_v48 }
 0x4e2   :  { %v966_v23 = vmul.f32 0.5, %v965_v52 }
 0x4e3   :  { %v978_v24 = vmul.f32 %v976_v20, %v974_v21 }
 0x4e4   :  { %v967_v25 = vsub.f32 1.5, %v966_v23 }
 0x4e5   :  { %v981_v26 = vadd.f32 %v980_v22, %v978_v24 }
 0x4e6   :  { %v968_v27 = vmul.f32 %v2389_v15, %v967_v25 }
 0x4e7   :  { %2249 = vmatmul.msk.f32.vlgmr.msra.gmra.mxu3 %vm79_vm0, %v981_v26 }
 0x4e8   :  { %v972_v28 = vsel %vm971_vm3, %v2389_v15, %v968_v27 }
 0x4e9   :  { %v975_v62 = vmul.f32 %v973_v16, %v972_v28 }
 0x4eb   :  { %v979_v60 = vmul.f32 %v977_v29, %v975_v62 }
 0x4ed   :  { %v982_v30 = vadd.f32 %v980_v22, %v979_v60 }
 0x4ef   :  { %2250 = vmatmul.msk.f32.gmra.mxu3 %vm79_vm0, %v982_v30 }
 0x56a   :  { %v1007_v32 = vpop.f32.mrf.mxu3 }
 0x56b   :  { %v2843_v33 = vadd.f32 %v1007_v32, %v983_v31 }
 0x56d   :  { %v2846_v34 = vmul.f32 0.70710677, %v2843_v33 }
 0x56f   :  { %v1017_v35 = vand.u32 2147483647, %v2846_v34  ;;  %vm1083_vm13 = vcmp.ge.f32.partialorder %v2846_v34, 0.0 }
 0x571   :  { %v1019_v37 = vmul.f32 0.3275911, %v1017_v35  ;;  %v1071_v4 = vsub.f32 0.0, %v1017_v35 }
 0x572   :  { %v1010_v38 = vpop.f32.mrf.mxu3 }
 0x573   :  { %v1021_v39 = vadd.f32 1.0, %v1019_v37  ;;  %v2849_v40 = vadd.f32 %v1010_v38, %v983_v31  ;;  %v1073_v13 = vmul.f32 %v1071_v4, %v1017_v35 }
 0x575   :  { %2390 = vrcp.f32 %v1021_v39  ;;  %v2852_v42 = vmul.f32 0.70710677, %v2849_v40  ;;  %v1034_v53 = vand.u32 2147483648, %v1021_v39  ;;  %v1032_v56 = vand.u32 2147483647, %v1021_v39 }
 0x576   :  { %vm1028_vm5 = vweird.f32 %v1021_v39  ;;  %v1075_v18 = vmul.f32 1.442695, %v1073_v13 }
 0x577   :  { %v1018_v36 = vand.u32 2147483647, %v2852_v42  ;;  %v1035_v63 = vor.u32 1.1754944e-38, %v1034_v53  ;;  %vm1033_vm7 = vcmp.eq.f32.partialorder %v1032_v56, 8.507059e+37  ;;  %vm1084_vm15 = vcmp.ge.f32.partialorder %v2852_v42, 0.0 }
 0x578   :  { %v1014_v53 = vmul.f32 0.5, %v2849_v40 }
 0x579   :  { %v1020_v45 = vmul.f32 0.3275911, %v1018_v36  ;;  %v1072_v20 = vsub.f32 0.0, %v1018_v36 }
 0x57b   :  { %v2391_v47 = vpop.eup %2390  ;;  %v1022_v7 = vadd.f32 1.0, %v1020_v45  ;;  %v1074_v26 = vmul.f32 %v1072_v20, %v1018_v36  ;;  %v1013_v45 = vmul.f32 0.5, %v2843_v33  ;;  %v2446_v33 = vld [vmem:[#allocation5] sm:$0xff] }
 0x57c   :  { %v1024_v49 = vmul.f32 %v2391_v47, %v1021_v39  ;;  %vm1029_vm4 = vweird.f32 %v2391_v47  ;;  %v1125_v56 = vperm.slane %v2446_v33, 5 }
 0x57d   :  { %2392 = vrcp.f32 %v1022_v7  ;;  %vm1030_vm6 = vmor %vm1028_vm5, %vm1029_vm4  ;;  %v1049_v10 = vand.u32 2147483648, %v1022_v7  ;;  %v1047_v12 = vand.u32 2147483647, %v1022_v7  ;;  %vm1043_vm10 = vweird.f32 %v1022_v7 }
 0x57e   :  { %v1025_v51 = vsub.f32 1.0, %v1024_v49  ;;  %2394 = vpow2.f32 %v1075_v18  ;;  %v1077_v60 = vmul.f32 1.442695, %v1074_v26 }
 0x57f   :  { %v1050_v17 = vor.u32 1.1754944e-38, %v1049_v10  ;;  %vm1048_vm12 = vcmp.eq.f32.partialorder %v1047_v12, 8.507059e+37  ;;  %v2253_v10 = vld [vmem:[%s3190_s1 + $0x20] sm:$0xff] }
 0x580   :  { %v1026_v55 = vmul.f32 %v2391_v47, %v1025_v51  ;;  %2396 = vpow2.f32 %v1077_v60 }
 0x582   :  { %v1027_v59 = vadd.f32 %v2391_v47, %v1026_v55 }
 0x583   :  { %v2393_v44 = vpop.eup %2392 }
 0x584   :  { %v1031_v2 = vsel %vm1030_vm6, %v2391_v47, %v1027_v59  ;;  %v1039_v5 = vmul.f32 %v2393_v44, %v1022_v7  ;;  %vm1044_vm9 = vweird.f32 %v2393_v44  ;;  %v2395_v30 = vpop.eup %2394 }
 0x585   :  { %v1036_v3 = vsel %vm1033_vm7, %v1035_v63, %v1031_v2  ;;  %vm1045_vm11 = vmor %vm1043_vm10, %vm1044_vm9 }
 0x586   :  { %v1053_v6 = vmul.f32 1.0614054, %v1036_v3  ;;  %v1040_v8 = vsub.f32 1.0, %v1039_v5  ;;  %v2397_v47 = vpop.eup %2396  ;;  %v2256_v5 = vld [vmem:[%s3190_s1 + $0x38] sm:$0xff] }
 0x587   :  { %1227 = vmatpush.msrb.mxu1 %v2256_v5 }
 0x588   :  { %v1055_v9 = vadd.f32 -1.4531521, %v1053_v6  ;;  %v1041_v54 = vmul.f32 %v2393_v44, %v1040_v8  ;;  %v2254_v8 = vld [vmem:[%s3190_s1 + $0x28] sm:$0xff] }
 0x58a   :  { %v1057_v14 = vmul.f32 %v1055_v9, %v1036_v3  ;;  %v1042_v15 = vadd.f32 %v2393_v44, %v1041_v54 }
 0x58c   :  { %v1059_v16 = vadd.f32 1.4214138, %v1057_v14  ;;  %v1046_v48 = vsel %vm1045_vm11, %v2393_v44, %v1042_v15 }
 0x58d   :  { %v1051_v21 = vsel %vm1048_vm12, %v1050_v17, %v1046_v48 }
 0x58e   :  { %v1061_v52 = vmul.f32 %v1059_v16, %v1036_v3  ;;  %v1054_v22 = vmul.f32 1.0614054, %v1051_v21 }
 0x590   :  { %v1063_v23 = vadd.f32 -0.28449672, %v1061_v52  ;;  %v1056_v24 = vadd.f32 -1.4531521, %v1054_v22 }
 0x592   :  { %v1065_v25 = vmul.f32 %v1063_v23, %v1036_v3  ;;  %v1058_v27 = vmul.f32 %v1056_v24, %v1051_v21 }
 0x594   :  { %v1067_v28 = vadd.f32 0.2548296, %v1065_v25  ;;  %v1060_v29 = vadd.f32 1.4214138, %v1058_v27  ;;  %v2917_v25 = vld [vmem:[#allocation5 + $0x8] sm:$0xff] }
 0x596   :  { %v1069_v62 = vmul.f32 %v1067_v28, %v1036_v3  ;;  %v1062_v31 = vmul.f32 %v1060_v29, %v1051_v21  ;;  %v1198_v28 = vperm.slane %v2917_v25, 2 }
 0x598   :  { %v1079_v32 = vmul.f32 %v2395_v30, %v1069_v62  ;;  %v1064_v35 = vadd.f32 -0.28449672, %v1062_v31 }
 0x59a   :  { %v1081_v37 = vsub.f32 1.0, %v1079_v32  ;;  %v1066_v38 = vmul.f32 %v1064_v35, %v1051_v21 }
 0x59c   :  { %v1085_v39 = vsub.f32 0.0, %v1081_v37  ;;  %v1068_v41 = vadd.f32 0.2548296, %v1066_v38 }
 0x59e   :  { %v1087_v43 = vsel %vm1083_vm13, %v1081_v37, %v1085_v39  ;;  %v1070_v46 = vmul.f32 %v1068_v41, %v1051_v21  ;;  %v1205_v37 = vperm.slane %v2917_v25, 3 }
 0x59f   :  { %v1089_v36 = vadd.f32 1.0, %v1087_v43 }
 0x5a0   :  { %v1080_v7 = vmul.f32 %v2397_v47, %v1070_v46 }
 0x5a1   :  { %v1091_v49 = vmul.f32 %v1089_v36, %v1013_v45 }
 0x5a2   :  { %v1082_v50 = vsub.f32 1.0, %v1080_v7 }
 0x5a3   :  { %2251 = vmatmul.msk.f32.vlgmr.msrb.gmra.mxu0 %vm1093_vm14, %v1091_v49 }
 0x5a4   :  { %v1086_v51 = vsub.f32 0.0, %v1082_v50 }
 0x5a6   :  { %v1088_v0 = vsel %vm1084_vm15, %v1082_v50, %v1086_v51  ;;  %v1208_v50 = vperm.slane %v2917_v25, 0 }
 0x5a7   :  { %v1090_v34 = vadd.f32 1.0, %v1088_v0 }
 0x5a9   :  { %v1092_v55 = vmul.f32 %v1090_v34, %v1014_v53 }
 0x5ab   :  { %2252 = vmatmul.msk.f32.gmra.mxu0 %vm1093_vm14, %v1092_v55 }
 0x620   :  { %v1117_v57 = vpop.f32.mrf.mxu0 }
 0x621   :  { %v1123_v58 = vadd.f32 %v1117_v57, %v2803_v61 }
 0x623   :  { %v2886_v59 = vadd.f32 %v1125_v56, %v1123_v58 }
 0x625   :  { %v1154_v11 = vsel %vm79_vm0, %v2886_v59, 0.0  ;;  %v1162_v42 = vmul.f32 %v2886_v59, %v2886_v59 }
 0x626   :  { %1155 = vadd.xlane.f32.xlu1 %v1154_v11 }
 0x627   :  { %v1164_v40 = vsel %vm79_vm0, %v1162_v42, 0.0 }
 0x628   :  { %1165 = vadd.xlane.f32.xlu2 %v1164_v40  ;;  %v1120_v63 = vpop.f32.mrf.mxu0 }
 0x629   :  { %v1124_v44 = vadd.f32 %v1120_v63, %v2813_v1  ;;  %v2255_v1 = vld [vmem:[%s3190_s1 + $0x30] sm:$0xff] }
 0x62a   :  { %1228 = vmatpush.msrb.mxu1 %v2255_v1 }
 0x62b   :  { %v2894_v2 = vadd.f32 %v1125_v56, %v1124_v44 }
 0x62c   :  { %1229 = vmatpush.msrb.mxu1 %v2254_v8 }
 0x62d   :  { %v1157_v61 = vsel %vm79_vm0, %v2894_v2, 0.0  ;;  %v1163_v3 = vmul.f32 %v2894_v2, %v2894_v2 }
 0x62e   :  { %1158 = vadd.xlane.f32.xlu0 %v1157_v61  ;;  %1230 = vmatpush.msrb.mxu1 %v2253_v10 }
 0x62f   :  { %v1167_v4 = vsel %vm79_vm0, %v1163_v3, 0.0 }
 0x630   :  { %1168 = vadd.xlane.f32.xlu1 %v1167_v4 }
 0x699   :  { %v1156_v6 = vpop.xlane.xlu1 %1155 }
 0x69a   :  { %v1160_v9 = vmul.f32 %v1156_v6, %v2613_v19 }
 0x69b   :  { %v1166_v13 = vpop.xlane.xlu2 %1165 }
 0x69c   :  { %v1172_v54 = vmul.f32 %v1160_v9, %v1160_v9  ;;  %v1170_v12 = vmul.f32 %v1166_v13, %v2613_v19  ;;  %v1201_v31 = vsub.f32 %v2886_v59, %v1160_v9 }
 0x69e   :  { %v1174_v14 = vsub.f32 %v1170_v12, %v1172_v54 }
 0x6a0   :  { %v1176_v15 = vadd.f32 1e-05, %v1174_v14 }
 0x6a1   :  { %v1159_v16 = vpop.xlane.xlu0 %1158 }
 0x6a2   :  { %2398 = vrsqrt.f32 %v1176_v15  ;;  %v1161_v17 = vmul.f32 %v1159_v16, %v2613_v19  ;;  %vm1184_vm2 = vweird.f32 %v1176_v15 }
 0x6a3   :  { %v1169_v18 = vpop.xlane.xlu1 %1168 }
 0x6a4   :  { %v1173_v48 = vmul.f32 %v1161_v17, %v1161_v17  ;;  %v1171_v52 = vmul.f32 %v1169_v18, %v2613_v19  ;;  %v1202_v46 = vsub.f32 %v2894_v2, %v1161_v17 }
 0x6a6   :  { %v1175_v20 = vsub.f32 %v1171_v52, %v1173_v48 }
 0x6a8   :  { %v2399_v21 = vpop.eup %2398  ;;  %v1177_v23 = vadd.f32 1e-05, %v1175_v20 }
 0x6a9   :  { %v1179_v22 = vmul.f32 %v2399_v21, %v1176_v15  ;;  %vm1185_vm1 = vweird.f32 %v2399_v21 }
 0x6aa   :  { %2400 = vrsqrt.f32 %v1177_v23  ;;  %vm1186_vm3 = vmor %vm1184_vm2, %vm1185_vm1  ;;  %vm1194_vm5 = vweird.f32 %v1177_v23 }
 0x6ab   :  { %v1180_v24 = vmul.f32 %v2399_v21, %v1179_v22 }
 0x6ad   :  { %v1181_v26 = vmul.f32 0.5, %v1180_v24 }
 0x6af   :  { %v1182_v27 = vsub.f32 1.5, %v1181_v26 }
 0x6b0   :  { %v2401_v29 = vpop.eup %2400 }
 0x6b1   :  { %v1183_v62 = vmul.f32 %v2399_v21, %v1182_v27  ;;  %v1189_v60 = vmul.f32 %v2401_v29, %v1177_v23  ;;  %vm1195_vm4 = vweird.f32 %v2401_v29 }
 0x6b2   :  { %vm1196_vm6 = vmor %vm1194_vm5, %vm1195_vm4 }
 0x6b3   :  { %v1187_v30 = vsel %vm1186_vm3, %v2399_v21, %v1183_v62  ;;  %v1190_v35 = vmul.f32 %v2401_v29, %v1189_v60 }
 0x6b4   :  { %v1199_v32 = vmul.f32 %v1198_v28, %v1187_v30 }
 0x6b5   :  { %v1191_v39 = vmul.f32 0.5, %v1190_v35 }
 0x6b6   :  { %v1203_v38 = vmul.f32 %v1201_v31, %v1199_v32 }
 0x6b7   :  { %v1192_v41 = vsub.f32 1.5, %v1191_v39 }
 0x6b8   :  { %v1206_v43 = vadd.f32 %v1205_v37, %v1203_v38 }
 0x6b9   :  { %v1193_v45 = vmul.f32 %v2401_v29, %v1192_v41 }
 0x6ba   :  { %2273 = vmatmul.msk.f32.vlgmr.msrb.gmra.mxu1 %vm79_vm0, %v1206_v43 }
 0x6bb   :  { %v1197_v36 = vsel %vm1196_vm6, %v2401_v29, %v1193_v45 }
 0x6bc   :  { %v1200_v47 = vmul.f32 %v1198_v28, %v1197_v36 }
 0x6be   :  { %v1204_v49 = vmul.f32 %v1202_v46, %v1200_v47 }
 0x6c0   :  { %v1207_v7 = vadd.f32 %v1205_v37, %v1204_v49 }
 0x6c2   :  { %2274 = vmatmul.msk.f32.gmra.mxu1 %vm79_vm0, %v1207_v7 }
 0x737   :  { %v1232_v51 = vpop.f32.mrf.mxu1 }
 0x738   :  { %v2926_v0 = vadd.f32 %v1232_v51, %v1208_v50 }
 0x73a   :  { %1256 = vrot.lane.b32.xlu0 %v2926_v0, %s2535_s19  ;;  %1252 = vrot.lane.b32.xlu2 %v2926_v0, %s2533_s17 }
 0x73f   :  { %v1235_v53 = vpop.f32.mrf.mxu1 }
 0x740   :  { %v2932_v34 = vadd.f32 %v1235_v53, %v1208_v50 }
 0x742   :  { %1240 = vrot.lane.b32.xlu0 %v2926_v0, %s2531_s15  ;;  %1254 = vrot.lane.b32.xlu1 %v2932_v34, %s2533_s17  ;;  %v2986_v21 = vpack.i.bf16 %v2932_v34, %v2926_v0 }
 0x743   :  { %1262 = vrot.lane.b32.xlu2 %v2932_v34, %s2532_s16 }
 0x74a   :  { %1246 = vrot.lane.b32.xlu0 %v2932_v34, %s2537_s21  ;;  %1264 = vrot.lane.b32.xlu1 %v2926_v0, %s2534_s18 }
 0x74b   :  { %1248 = vrot.lane.b32.xlu2 %v2926_v0, %s2536_s20 }
 0x752   :  { %1244 = vrot.lane.b32.xlu0 %v2926_v0, %s2537_s21  ;;  %1260 = vrot.lane.b32.xlu1 %v2926_v0, %s2532_s16 }
 0x753   :  { %1258 = vrot.lane.b32.xlu2 %v2932_v34, %s2535_s19 }
 0x75a   :  { %1266 = vrot.lane.b32.xlu0 %v2932_v34, %s2534_s18  ;;  %1242 = vrot.lane.b32.xlu1 %v2932_v34, %s2531_s15 }
 0x75b   :  { %1250 = vrot.lane.b32.xlu2 %v2932_v34, %s2536_s20 }
 0x794   :  { %v1253_v55 = vpop.permute.xlu2 %1252 }
 0x795   :  { %2275 = vmatpush.xpose.msk.msrb.mxu2 %vm225_vm8, %v1253_v55 }
 0x798   :  { %2276 = vmatmul.msk.f32.vlgmr.msrb.gmra.mxu2 %vm225_vm8, %v2926_v0 }
 0x79d   :  { %v1263_v33 = vpop.permute.xlu2 %1262 }
 0x7a5   :  { %v1249_v56 = vpop.permute.xlu2 %1248 }
 0x7ac   :  { %v1257_v57 = vpop.permute.xlu0 %1256 }
 0x7ad   :  { %v1259_v58 = vpop.permute.xlu2 %1258  ;;  %2279 = vmatpush.xpose.msk.msrb.mxu3 %vm225_vm8, %v1257_v57 }
 0x7ae   :  { %2281 = vmatpush.xpose.msk.msra.mxu0 %vm225_vm8, %v1259_v58 }
 0x7b4   :  { %v1241_v11 = vpop.permute.xlu0 %1240  ;;  %v1255_v42 = vpop.permute.xlu1 %1254 }
 0x7b5   :  { %2280 = vmatmul.msk.f32.vlgmr.msrb.gmra.mxu3 %vm225_vm8, %v1241_v11  ;;  %2277 = vmatpush.xpose.msk.msra.mxu2 %vm225_vm8, %v1255_v42  ;;  %v1251_v5 = vpop.permute.xlu2 %1250 }
 0x7b8   :  { %2278 = vmatmul.msk.f32.vlgmr.msra.gmra.mxu2 %vm225_vm8, %v2932_v34 }
 0x7b9   :  { %2285 = vmatpush.xpose.msk.msrb.mxu2 %vm225_vm8, %v1263_v33 }
 0x7bc   :  { %v1247_v40 = vpop.permute.xlu0 %1246  ;;  %v1265_v63 = vpop.permute.xlu1 %1264 }
 0x7bd   :  { %2287 = vmatpush.xpose.msk.msra.mxu3 %vm225_vm8, %v1265_v63 }
 0x7c0   :  { %2286 = vmatmul.msk.f32.vlgmr.msrb.gmra.mxu2 %vm225_vm8, %v1247_v40  ;;  %2288 = vmatmul.msk.f32.vlgmr.msra.gmra.mxu3 %vm225_vm8, %v1249_v56 }
 0x7c4   :  { %v1245_v44 = vpop.permute.xlu0 %1244  ;;  %v1261_v61 = vpop.permute.xlu1 %1260 }
 0x7c5   :  { %2283 = vmatpush.xpose.msk.msra.mxu1 %vm225_vm8, %v1261_v61 }
 0x7c8   :  { %2284 = vmatmul.msk.f32.vlgmr.msra.gmra.mxu1 %vm225_vm8, %v1245_v44 }
 0x7cc   :  { %v1267_v3 = vpop.permute.xlu0 %1266  ;;  %v1243_v4 = vpop.permute.xlu1 %1242 }
 0x7cd   :  { %2289 = vmatpush.xpose.msk.msrb.mxu0 %vm225_vm8, %v1267_v3 }
 0x7ce   :  { %2282 = vmatmul.msk.f32.vlgmr.msra.gmra.mxu0 %vm225_vm8, %v1243_v4 }
 0x7d6   :  { %2290 = vmatmul.msk.f32.vlgmr.msrb.gmra.mxu0 %vm225_vm8, %v1251_v5 }
 0x81b   :  { %v1313_v1 = vpop.f32.mrf.mxu2 }
 0x81c   :  { %v1484_v16 = vsel %vm225_vm8, %v1313_v1, -inf }
 0x838   :  { %v1361_v6 = vpop.f32.mrf.mxu3 }
 0x839   :  { %v1490_v8 = vsel %vm225_vm8, %v1361_v6, -inf }
 0x83a   :  { %1491 = vmax.xlane.f32.xlu0 %v1490_v8 }
 0x83b   :  { %v1337_v9 = vpop.f32.mrf.mxu2 }
 0x83c   :  { %v1487_v10 = vsel %vm225_vm8, %v1337_v9, -inf }
 0x83d   :  { %1488 = vmax.xlane.f32.xlu2 %v1487_v10 }
 0x843   :  { %v1457_v13 = vpop.f32.mrf.mxu3  ;;  %v1433_v52 = vpop.f32.mrf.mxu2 }
 0x844   :  { %v1502_v54 = vsel %vm225_vm8, %v1457_v13, -inf  ;;  %v1499_v20 = vsel %vm225_vm8, %v1433_v52, -inf }
 0x845   :  { %v1409_v12 = vpop.f32.mrf.mxu1  ;;  %1503 = vmax.xlane.f32.xlu2 %v1502_v54 }
 0x846   :  { %v1496_v14 = vsel %vm225_vm8, %v1409_v12, -inf }
 0x847   :  { %1497 = vmax.xlane.f32.xlu1 %v1496_v14 }
 0x84b   :  { %v1385_v15 = vpop.f32.mrf.mxu0 }
 0x84c   :  { %v1493_v48 = vsel %vm225_vm8, %v1385_v15, -inf }
 0x84f   :  { %1485 = vmax.xlane.f32.xlu1 %v1484_v16 }
 0x853   :  { %v1481_v17 = vpop.f32.mrf.mxu0 }
 0x854   :  { %v1505_v18 = vsel %vm225_vm8, %v1481_v17, -inf }
 0x855   :  { %1506 = vmax.xlane.f32.xlu0 %v1505_v18 }
 0x857   :  { %1494 = vmax.xlane.f32.xlu1 %v1493_v48 }
 0x85d   :  { %1500 = vmax.xlane.f32.xlu0 %v1499_v20 }
 0x870   :  { %2339 = vrot.lane.b32.xlu1 %v2986_v21, %s2538_s22 }
 0x871   :  { %1274 = vrot.lane.b32.xlu0 %v2926_v0, %s2539_s23 }
 0x8ad   :  { %v1492_v22 = vpop.xlane.xlu0 %1491 }
 0x8ae   :  { %v1510_v23 = vsub.f32 %v1361_v6, %v1492_v22 }
 0x8b0   :  { %v1520_v24 = vmul.f32 1.442695, %v1510_v23  ;;  %v1489_v26 = vpop.xlane.xlu2 %1488 }
 0x8b1   :  { %v1509_v27 = vsub.f32 %v1337_v9, %v1489_v26 }
 0x8b2   :  { %2402 = vpow2.f32 %v1520_v24 }
 0x8b3   :  { %v1518_v28 = vmul.f32 1.442695, %v1509_v27 }
 0x8b5   :  { %2404 = vpow2.f32 %v1518_v28 }
 0x8b8   :  { %v2992_v29 = vpop.eup %2402  ;;  %v1504_v62 = vpop.xlane.xlu2 %1503 }
 0x8b9   :  { %v1538_v60 = vsel %vm225_vm8, %v2992_v29, 0.0  ;;  %v1514_v30 = vsub.f32 %v1457_v13, %v1504_v62 }
 0x8ba   :  { %1539 = vadd.xlane.f32.xlu1 %v1538_v60  ;;  %v1498_v31 = vpop.xlane.xlu1 %1497 }
 0x8bb   :  { %v2996_v32 = vpop.eup %2404  ;;  %v1528_v35 = vmul.f32 1.442695, %v1514_v30  ;;  %v1512_v37 = vsub.f32 %v1409_v12, %v1498_v31 }
 0x8bc   :  { %v1535_v38 = vsel %vm225_vm8, %v2996_v32, 0.0 }
 0x8bd   :  { %2406 = vpow2.f32 %v1528_v35  ;;  %v1524_v39 = vmul.f32 1.442695, %v1512_v37  ;;  %1536 = vadd.xlane.f32.xlu0 %v1535_v38 }
 0x8bf   :  { %2408 = vpow2.f32 %v1524_v39 }
 0x8c2   :  { %v1486_v41 = vpop.xlane.xlu1 %1485 }
 0x8c3   :  { %v3000_v43 = vpop.eup %2406  ;;  %v1508_v45 = vsub.f32 %v1313_v1, %v1486_v41 }
 0x8c4   :  { %v1550_v36 = vsel %vm225_vm8, %v3000_v43, 0.0 }
 0x8c5   :  { %v3004_v46 = vpop.eup %2408  ;;  %v1516_v47 = vmul.f32 1.442695, %v1508_v45  ;;  %1551 = vadd.xlane.f32.xlu0 %v1550_v36 }
 0x8c6   :  { %v1544_v49 = vsel %vm225_vm8, %v3004_v46, 0.0 }
 0x8c7   :  { %2410 = vpow2.f32 %v1516_v47  ;;  %1545 = vadd.xlane.f32.xlu2 %v1544_v49 }
 0x8c8   :  { %v1507_v7 = vpop.xlane.xlu0 %1506 }
 0x8c9   :  { %v1515_v55 = vsub.f32 %v1481_v17, %v1507_v7 }
 0x8ca   :  { %v1495_v50 = vpop.xlane.xlu1 %1494 }
 0x8cb   :  { %v1511_v51 = vsub.f32 %v1385_v15, %v1495_v50  ;;  %v1530_v11 = vmul.f32 1.442695, %v1515_v55 }
 0x8cd   :  { %v3008_v53 = vpop.eup %2410  ;;  %v1522_v33 = vmul.f32 1.442695, %v1511_v51 }
 0x8ce   :  { %v1532_v56 = vsel %vm225_vm8, %v3008_v53, 0.0 }
 0x8cf   :  { %2412 = vpow2.f32 %v1522_v33  ;;  %1533 = vadd.xlane.f32.xlu2 %v1532_v56 }
 0x8d0   :  { %v1501_v57 = vpop.xlane.xlu0 %1500 }
 0x8d1   :  { %v1513_v58 = vsub.f32 %v1433_v52, %v1501_v57 }
 0x8d3   :  { %v1526_v42 = vmul.f32 1.442695, %v1513_v58 }
 0x8d5   :  { %2414 = vpow2.f32 %v1526_v42  ;;  %v3012_v40 = vpop.eup %2412 }
 0x8d6   :  { %2416 = vpow2.f32 %v1530_v11  ;;  %v1541_v63 = vsel %vm225_vm8, %v3012_v40, 0.0 }
 0x8d7   :  { %1542 = vadd.xlane.f32.xlu2 %v1541_v63 }
 0x8d9   :  { %1286 = vrot.lane.b32.xlu0 %v2926_v0, %s2540_s24 }
 0x8db   :  { %v3018_v44 = vpop.eup %2414 }
 0x8dc   :  { %v3020_v61 = vpop.eup %2416  ;;  %v1547_v3 = vsel %vm225_vm8, %v3018_v44, 0.0 }
 0x8dd   :  { %1548 = vadd.xlane.f32.xlu1 %v1547_v3  ;;  %v1553_v4 = vsel %vm225_vm8, %v3020_v61, 0.0 }
 0x8df   :  { %1554 = vadd.xlane.f32.xlu2 %v1553_v4 }
 0x8e1   :  { %1288 = vrot.lane.b32.xlu0 %v2932_v34, %s2540_s24 }
 0x8e2   :  { %v2340_v5 = vpop.permute.xlu1 %2339 }
 0x8e3   :  { %v1275_v1 = vpop.permute.xlu0 %1274  ;;  %v2342_v6 = vunpack.i.h.bf16 %v2340_v5  ;;  %v2341_v8 = vunpack.i.l.bf16 %v2340_v5 }
 0x8e4   :  { %1740 = vmatpush.msrb.mxu3 %v1275_v1 }
 0x8e5   :  { %1694 = vmatpush.msrb.mxu1 %v2341_v8  ;;  %1717 = vmatpush.msra.mxu2 %v2342_v6 }
 0x8f6   :  { %1276 = vrot.lane.b32.xlu1 %v2932_v34, %s2539_s23 }
 0x8f7   :  { %2344 = vrot.lane.b32.xlu2 %v2986_v21, %s2541_s25 }
 0x92d   :  { %v1540_v0 = vpop.xlane.xlu1 %1539 }
 0x92e   :  { %2418 = vrcp.f32 %v1540_v0  ;;  %v1595_v14 = vand.u32 2147483647, %v1540_v0  ;;  %v1597_v15 = vand.u32 2147483648, %v1540_v0  ;;  %vm1591_vm9 = vweird.f32 %v1540_v0 }
 0x930   :  { %v1537_v9 = vpop.xlane.xlu0 %1536  ;;  %vm1596_vm11 = vcmp.eq.f32.partialorder %v1595_v14, 8.507059e+37  ;;  %v1598_v20 = vor.u32 1.1754944e-38, %v1597_v15 }
 0x931   :  { %2420 = vrcp.f32 %v1537_v9  ;;  %v1582_v21 = vand.u32 2147483648, %v1537_v9  ;;  %v1580_v24 = vand.u32 2147483647, %v1537_v9  ;;  %vm1576_vm13 = vweird.f32 %v1537_v9 }
 0x933   :  { %v1583_v60 = vor.u32 1.1754944e-38, %v1582_v21  ;;  %vm1581_vm1 = vcmp.eq.f32.partialorder %v1580_v24, 8.507059e+37 }
 0x934   :  { %v2419_v10 = vpop.eup %2418 }
 0x935   :  { %v1587_v13 = vmul.f32 %v2419_v10, %v1540_v0  ;;  %vm1592_vm7 = vweird.f32 %v2419_v10 }
 0x936   :  { %vm1593_vm10 = vmor %vm1591_vm9, %vm1592_vm7 }
 0x937   :  { %v1588_v54 = vsub.f32 1.0, %v1587_v13  ;;  %v2421_v12 = vpop.eup %2420 }
 0x938   :  { %v1572_v17 = vmul.f32 %v2421_v12, %v1537_v9  ;;  %v1552_v18 = vpop.xlane.xlu0 %1551  ;;  %vm1577_vm12 = vweird.f32 %v2421_v12 }
 0x939   :  { %v1589_v16 = vmul.f32 %v2419_v10, %v1588_v54  ;;  %2422 = vrcp.f32 %v1552_v18  ;;  %vm1578_vm15 = vmor %vm1576_vm13, %vm1577_vm12  ;;  %v1657_v45 = vand.u32 2147483648, %v1552_v18  ;;  %v1655_v47 = vand.u32 2147483647, %v1552_v18 }
 0x93a   :  { %v1573_v34 = vsub.f32 1.0, %v1572_v17  ;;  %v3032_v52 = vpop.xlane.xlu2 %1545  ;;  %vm1651_vm3 = vweird.f32 %v1552_v18 }
 0x93b   :  { %v1590_v48 = vadd.f32 %v2419_v10, %v1589_v16  ;;  %2424 = vrcp.f32 %v3032_v52  ;;  %v1658_v7 = vor.u32 1.1754944e-38, %v1657_v45  ;;  %vm1656_vm5 = vcmp.eq.f32.partialorder %v1655_v47, 8.507059e+37 }
 0x93c   :  { %v1574_v23 = vmul.f32 %v2421_v12, %v1573_v34  ;;  %v1627_v13 = vand.u32 2147483648, %v3032_v52  ;;  %vm1621_vm12 = vweird.f32 %v3032_v52 }
 0x93d   :  { %v1594_v22 = vsel %vm1593_vm10, %v2419_v10, %v1590_v48 }
 0x93e   :  { %v1599_v26 = vsel %vm1596_vm11, %v1598_v20, %v1594_v22  ;;  %v1575_v27 = vadd.f32 %v2421_v12, %v1574_v23 }
 0x93f   :  { %v1600_v28 = vmul.f32 %v2992_v29, %v1599_v26  ;;  %v2423_v62 = vpop.eup %2422 }
 0x940   :  { %v1579_v30 = vsel %vm1578_vm15, %v2421_v12, %v1575_v27  ;;  %v1647_v31 = vmul.f32 %v2423_v62, %v1552_v18  ;;  %vm1652_vm2 = vweird.f32 %v2423_v62  ;;  %v1625_v12 = vand.u32 2147483647, %v3032_v52 }
 0x941   :  { %2293 = vmatmul.msk.f32.vlgmr.msrb.gmra.mxu3 %vm225_vm8, %v1600_v28  ;;  %v1584_v35 = vsel %vm1581_vm1, %v1583_v60, %v1579_v30  ;;  %v2425_v41 = vpop.eup %2424  ;;  %vm1653_vm4 = vmor %vm1651_vm3, %vm1652_vm2  ;;  %v1628_v18 = vor.u32 1.1754944e-38, %v1627_v13 }
 0x942   :  { %v1648_v37 = vsub.f32 1.0, %v1647_v31  ;;  %v1534_v38 = vpop.xlane.xlu2 %1533  ;;  %v1585_v39 = vmul.f32 %v2996_v32, %v1584_v35  ;;  %v1617_v49 = vmul.f32 %v2425_v41, %v3032_v52  ;;  %vm1622_vm9 = vweird.f32 %v2425_v41 }
 0x943   :  { %2426 = vrcp.f32 %v1534_v38  ;;  %v1567_v42 = vand.u32 2147483648, %v1534_v38  ;;  %v1565_v4 = vand.u32 2147483647, %v1534_v38  ;;  %vm1561_vm7 = vweird.f32 %v1534_v38  ;;  %vm1623_vm13 = vmor %vm1621_vm12, %vm1622_vm9 }
 0x944   :  { %v1649_v36 = vmul.f32 %v2423_v62, %v1648_v37  ;;  %2292 = vmatmul.msk.f32.vlgmr.msra.gmra.mxu2 %vm225_vm8, %v1585_v39  ;;  %v1618_v33 = vsub.f32 1.0, %v1617_v49  ;;  %vm1626_vm15 = vcmp.eq.f32.partialorder %v1625_v12, 8.507059e+37 }
 0x945   :  { %vm1566_vm11 = vcmp.eq.f32.partialorder %v1565_v4, 8.507059e+37 }
 0x946   :  { %v1650_v29 = vadd.f32 %v2423_v62, %v1649_v36  ;;  %v1619_v63 = vmul.f32 %v2425_v41, %v1618_v33 }
 0x948   :  { %v1654_v50 = vsel %vm1653_vm4, %v2423_v62, %v1650_v29  ;;  %v1620_v8 = vadd.f32 %v2425_v41, %v1619_v63 }
 0x949   :  { %v2427_v51 = vpop.eup %2426  ;;  %v1659_v55 = vsel %vm1656_vm5, %v1658_v7, %v1654_v50 }
 0x94a   :  { %v1557_v32 = vmul.f32 %v2427_v51, %v1534_v38  ;;  %v3040_v56 = vpop.xlane.xlu2 %1542  ;;  %v1660_v57 = vmul.f32 %v3000_v43, %v1659_v55  ;;  %vm1562_vm6 = vweird.f32 %v2427_v51  ;;  %v1568_v43 = vor.u32 1.1754944e-38, %v1567_v42 }
 0x94b   :  { %2428 = vrcp.f32 %v3040_v56  ;;  %v1287_v58 = vpop.permute.xlu0 %1286  ;;  %vm1563_vm10 = vmor %vm1561_vm7, %vm1562_vm6  ;;  %v1624_v17 = vsel %vm1623_vm13, %v2425_v41, %v1620_v8  ;;  %v1612_v35 = vand.u32 2147483648, %v3040_v56  ;;  %vm1606_vm5 = vweird.f32 %v3040_v56 }
 0x94c   :  { %v1558_v11 = vsub.f32 1.0, %v1557_v32  ;;  %1832 = vmatpush.msra.mxu3 %v1287_v58  ;;  %v1629_v20 = vsel %vm1626_vm15, %v1628_v18, %v1624_v17  ;;  %v1610_v38 = vand.u32 2147483647, %v3040_v56  ;;  %v2258_v58 = vld [vmem:[%s3191_s2 + $0x28] sm:$0xff] }
 0x94d   :  { %2297 = vmatmul.msk.f32.vlgmr.msra.gmra.mxu3 %vm225_vm8, %v1660_v57  ;;  %v1630_v62 = vmul.f32 %v3004_v46, %v1629_v20  ;;  %v1613_v47 = vor.u32 1.1754944e-38, %v1612_v35 }
 0x94e   :  { %v1559_v3 = vmul.f32 %v2427_v51, %v1558_v11  ;;  %vm1611_vm9 = vcmp.eq.f32.partialorder %v1610_v38, 8.507059e+37  ;;  %v2257_v11 = vld [vmem:[%s3191_s2 + $0x20] sm:$0xff] }
 0x950   :  { %v1549_v5 = vpop.xlane.xlu1 %1548  ;;  %v1560_v1 = vadd.f32 %v2427_v51, %v1559_v3 }
 0x951   :  { %2430 = vrcp.f32 %v1549_v5  ;;  %v2429_v6 = vpop.eup %2428  ;;  %v1640_v23 = vand.u32 2147483647, %v1549_v5  ;;  %v1642_v24 = vand.u32 2147483648, %v1549_v5  ;;  %vm1636_vm2 = vweird.f32 %v1549_v5 }
 0x952   :  { %v1564_v0 = vsel %vm1563_vm10, %v2427_v51, %v1560_v1  ;;  %v1602_v9 = vmul.f32 %v2429_v6, %v3040_v56  ;;  %v3046_v10 = vpop.xlane.xlu2 %1554  ;;  %vm1607_vm3 = vweird.f32 %v2429_v6 }
 0x953   :  { %v1569_v54 = vsel %vm1566_vm11, %v1568_v43, %v1564_v0  ;;  %2432 = vrcp.f32 %v3046_v10  ;;  %v1643_v37 = vor.u32 1.1754944e-38, %v1642_v24  ;;  %vm1641_vm6 = vcmp.eq.f32.partialorder %v1640_v23, 8.507059e+37  ;;  %vm1608_vm7 = vmor %vm1606_vm5, %vm1607_vm3 }
 0x954   :  { %v1570_v14 = vmul.f32 %v3008_v53, %v1569_v54  ;;  %v1603_v15 = vsub.f32 1.0, %v1602_v9  ;;  %v1672_v7 = vand.u32 2147483648, %v3046_v10  ;;  %vm1666_vm11 = vweird.f32 %v3046_v10 }
 0x955   :  { %v1670_v50 = vand.u32 2147483647, %v3046_v10 }
 0x956   :  { %2291 = vmatmul.msk.f32.vlgmr.msrb.gmra.mxu1 %vm225_vm8, %v1570_v14  ;;  %v1604_v21 = vmul.f32 %v2429_v6, %v1603_v15  ;;  %v1673_v32 = vor.u32 1.1754944e-38, %v1672_v7 }
 0x957   :  { %v2431_v16 = vpop.eup %2430  ;;  %vm1671_vm13 = vcmp.eq.f32.partialorder %v1670_v50, 8.507059e+37 }
 0x958   :  { %v1632_v48 = vmul.f32 %v2431_v16, %v1549_v5  ;;  %vm1637_vm1 = vweird.f32 %v2431_v16  ;;  %v1605_v60 = vadd.f32 %v2429_v6, %v1604_v21 }
 0x959   :  { %v2433_v34 = vpop.eup %2432  ;;  %vm1638_vm4 = vmor %vm1636_vm2, %vm1637_vm1 }
 0x95a   :  { %v1633_v22 = vsub.f32 1.0, %v1632_v48  ;;  %v1662_v26 = vmul.f32 %v2433_v34, %v3046_v10  ;;  %v2345_v52 = vpop.permute.xlu2 %2344  ;;  %v1609_v41 = vsel %vm1608_vm7, %v2429_v6, %v1605_v60  ;;  %vm1667_vm10 = vweird.f32 %v2433_v34 }
 0x95b   :  { %v2347_v53 = vunpack.i.h.bf16 %v2345_v52  ;;  %v2346_v28 = vunpack.i.l.bf16 %v2345_v52  ;;  %v1614_v29 = vsel %vm1611_vm9, %v1613_v47, %v1609_v41  ;;  %vm1668_vm12 = vmor %vm1666_vm11, %vm1667_vm10  ;;  %v2262_v41 = vld [vmem:[%s3192_s3 + $0x28] sm:$0xff]  ;;  %v2261_v47 = vld [vmem:[%s3192_s3 + $0x20] sm:$0xff] }
 0x95c   :  { %v1634_v27 = vmul.f32 %v2431_v16, %v1633_v22  ;;  %v1663_v31 = vsub.f32 1.0, %v1662_v26  ;;  %v1615_v55 = vmul.f32 %v3012_v40, %v1614_v29  ;;  %v2260_v40 = vld [vmem:[%s3191_s2 + $0x38] sm:$0xff] }
 0x95d   :  { %1786 = vmatpush.msra.mxu1 %v2346_v28  ;;  %1809 = vmatpush.msrb.mxu2 %v2347_v53 }
 0x95e   :  { %v1635_v30 = vadd.f32 %v2431_v16, %v1634_v27  ;;  %2295 = vmatmul.msk.f32.vlgmr.msra.gmra.mxu1 %vm225_vm8, %v1630_v62  ;;  %v1664_v45 = vmul.f32 %v2433_v34, %v1663_v31 }
 0x95f   :  { %1910 = vmatpush.msra.mxu2 %v2258_v58  ;;  %1881 = vmatpush.msrb.mxu1 %v2257_v11 }
 0x960   :  { %v1639_v39 = vsel %vm1638_vm4, %v2431_v16, %v1635_v30  ;;  %v1665_v49 = vadd.f32 %v2433_v34, %v1664_v45  ;;  %v1990_v16 = vperm.slane %v2917_v25, 1 }
 0x961   :  { %v1644_v46 = vsel %vm1641_vm6, %v1643_v37, %v1639_v39 }
 0x962   :  { %v1645_v36 = vmul.f32 %v3018_v44, %v1644_v46  ;;  %v1669_v33 = vsel %vm1668_vm12, %v2433_v34, %v1665_v49  ;;  %v1289_v44 = vpop.permute.xlu0 %1288  ;;  %v2264_v46 = vld [vmem:[%s3192_s3 + $0x38] sm:$0xff] }
 0x963   :  { %v1674_v56 = vsel %vm1671_vm13, %v1673_v32, %v1669_v33  ;;  %2068 = vmatpush.msra.mxu1 %v2264_v46 }
 0x964   :  { %2296 = vmatmul.msk.f32.vlgmr.msrb.gmra.mxu2 %vm225_vm8, %v1645_v36  ;;  %v1675_v57 = vmul.f32 %v3020_v61, %v1674_v56  ;;  %v2259_v61 = vld [vmem:[%s3191_s2 + $0x30] sm:$0xff]  ;;  %s2201_s2 = sshll.u32 %s3195_s6, 4  ;;  %s2202_s2 = int_to_ptr.hbm [resolvable:$true] %s2201_s2 }
 0x965   :  { %1939 = vmatpush.msrb.mxu3 %v2259_v61 }
 0x968   :  { %v1277_v51 = vpop.permute.xlu1 %1276 }
 0x969   :  { %1763 = vmatpush.msra.mxu0 %v1277_v51 }
 0x96a   :  { %2294 = vmatmul.msk.f32.vlgmr.msra.gmra.mxu0 %vm225_vm8, %v1615_v55 }
 0x96b   :  { %1855 = vmatpush.msrb.mxu0 %v1289_v44 }
 0x96d   :  { %1968 = vmatpush.msra.mxu0 %v2260_v40 }
 0x972   :  { %2298 = vmatmul.msk.f32.vlgmr.msrb.gmra.mxu0 %vm225_vm8, %v1675_v57 }
 0x9c4   :  { %v1742_v42 = vpop.f32.mrf.mxu3 }
 0x9c5   :  { %2301 = vmatmul.msk.f32.vlgmr.msra.gmra.mxu2 %vm225_vm8, %v1742_v42 }
 0x9c7   :  { %v1719_v4 = vpop.f32.mrf.mxu2 }
 0x9d0   :  { %v1834_v63 = vpop.f32.mrf.mxu3 }
 0x9d1   :  { %2305 = vmatmul.msk.f32.vlgmr.msra.gmra.mxu0 %vm225_vm8, %v1834_v63 }
 0x9d3   :  { %v1696_v3 = vpop.f32.mrf.mxu1 }
 0x9d4   :  { %2299 = vmatmul.msk.f32.vlgmr.msrb.gmra.mxu1 %vm225_vm8, %v1696_v3  ;;  %v2039_v3 = vperm.slane %v2917_v25, 6 }
 0x9db   :  { %v1788_v5 = vpop.f32.mrf.mxu1 }
 0x9dc   :  { %2300 = vmatmul.msk.f32.gmra.mxu1 %vm225_vm8, %v1719_v4  ;;  %2303 = vmatmul.msk.f32.vlgmr.msrb.gmra.mxu3 %vm225_vm8, %v1788_v5 }
 0x9e7   :  { %v1765_v1 = vpop.f32.mrf.mxu0  ;;  %v1811_v6 = vpop.f32.mrf.mxu2 }
 0x9e8   :  { %2302 = vmatmul.msk.f32.gmra.mxu2 %vm225_vm8, %v1765_v1  ;;  %2304 = vmatmul.msk.f32.gmra.mxu3 %vm225_vm8, %v1811_v6 }
 0x9ef   :  { %v1857_v43 = vpop.f32.mrf.mxu0 }
 0x9f0   :  { %2306 = vmatmul.msk.f32.gmra.mxu0 %vm225_vm8, %v1857_v43  ;;  %v2046_v43 = vperm.slane %v2917_v25, 7 }
 0xa48   :  { %v1912_v0 = vpop.f32.mrf.mxu2 }
 0xa49   :  { %v1977_v10 = vsel %vm79_vm0, %v1912_v0, 0.0 }
 0xa4e   :  { %v1970_v13 = vpop.f32.mrf.mxu0 }
 0xa4f   :  { %v1981_v17 = vsel %vm79_vm0, %v1970_v13, 0.0 }
 0xa51   :  { %v1883_v8 = vpop.f32.mrf.mxu1 }
 0xa52   :  { %v1976_v9 = vsel %vm79_vm0, %v1883_v8, 0.0 }
 0xa53   :  { %v1978_v54 = vadd.f32 %v1977_v10, %v1976_v9 }
 0xa59   :  { %v1886_v20 = vpop.f32.mrf.mxu1 }
 0xa5a   :  { %v1983_v26 = vsel %vm79_vm0, %v1886_v20, 0.0 }
 0xa5f   :  { %v1941_v12 = vpop.f32.mrf.mxu3 }
 0xa60   :  { %v1979_v14 = vsel %vm79_vm0, %v1941_v12, 0.0 }
 0xa61   :  { %v1980_v15 = vadd.f32 %v1979_v14, %v1978_v54 }
 0xa63   :  { %v1982_v18 = vadd.f32 %v1981_v17, %v1980_v15 }
 0xa65   :  { %v1991_v48 = vadd.f32 %v1990_v16, %v1982_v18 }
 0xa67   :  { %v3095_v34 = vadd.f32 %v1991_v48, %v2886_v59  ;;  %v2049_v48 = vperm.slane %v2917_v25, 4  ;;  %v2271_v25 = vld [vmem:[%s3193_s4 + $0x70] sm:$0xff] }
 0xa69   :  { %v1995_v21 = vsel %vm79_vm0, %v3095_v34, 0.0  ;;  %v2003_v22 = vmul.f32 %v3095_v34, %v3095_v34 }
 0xa6a   :  { %1996 = vadd.xlane.f32.xlu1 %v1995_v21 }
 0xa6b   :  { %v1915_v23 = vpop.f32.mrf.mxu2  ;;  %v1944_v24 = vpop.f32.mrf.mxu3  ;;  %v2005_v27 = vsel %vm79_vm0, %v2003_v22, 0.0 }
 0xa6c   :  { %v1984_v52 = vsel %vm79_vm0, %v1915_v23, 0.0  ;;  %2006 = vadd.xlane.f32.xlu2 %v2005_v27  ;;  %v1986_v59 = vsel %vm79_vm0, %v1944_v24, 0.0 }
 0xa6d   :  { %v1985_v53 = vadd.f32 %v1984_v52, %v1983_v26  ;;  %v1973_v28 = vpop.f32.mrf.mxu0  ;;  %v2272_v52 = vld [vmem:[%s3193_s4 + $0x78] sm:$0xff] }
 0xa6e   :  { %v1988_v60 = vsel %vm79_vm0, %v1973_v28, 0.0  ;;  %2173 = vmatpush.msrb.mxu2 %v2272_v52  ;;  %v2270_v28 = vld [vmem:[%s3193_s4 + $0x68] sm:$0xff] }
 0xa6f   :  { %v1987_v62 = vadd.f32 %v1986_v59, %v1985_v53 }
 0xa70   :  { %2174 = vmatpush.msrb.mxu2 %v2271_v25 }
 0xa71   :  { %v1989_v30 = vadd.f32 %v1988_v60, %v1987_v62  ;;  %v2269_v60 = vld [vmem:[%s3193_s4 + $0x60] sm:$0xff] }
 0xa72   :  { %2175 = vmatpush.msrb.mxu2 %v2270_v28 }
 0xa73   :  { %v1992_v31 = vadd.f32 %v1990_v16, %v1989_v30 }
 0xa74   :  { %2176 = vmatpush.msrb.mxu2 %v2269_v60 }
 0xa75   :  { %v3107_v35 = vadd.f32 %v1992_v31, %v2894_v2  ;;  %v2263_v2 = vld [vmem:[%s3192_s3 + $0x30] sm:$0xff] }
 0xa76   :  { %2069 = vmatpush.msra.mxu1 %v2263_v2  ;;  %v2267_v2 = vld [vmem:[%s3193_s4 + $0x50] sm:$0xff] }
 0xa77   :  { %v1998_v37 = vsel %vm79_vm0, %v3107_v35, 0.0  ;;  %v2004_v38 = vmul.f32 %v3107_v35, %v3107_v35 }
 0xa78   :  { %1999 = vadd.xlane.f32.xlu0 %v1998_v37  ;;  %2070 = vmatpush.msra.mxu1 %v2262_v41  ;;  %v2268_v37 = vld [vmem:[%s3193_s4 + $0x58] sm:$0xff] }
 0xa79   :  { %v2008_v39 = vsel %vm79_vm0, %v2004_v38, 0.0  ;;  %2177 = vmatpush.msrb.mxu2 %v2268_v37 }
 0xa7a   :  { %2009 = vadd.xlane.f32.xlu1 %v2008_v39  ;;  %2071 = vmatpush.msra.mxu1 %v2261_v47  ;;  %v2266_v47 = vld [vmem:[%s3193_s4 + $0x48] sm:$0xff] }
 0xa7b   :  { %2178 = vmatpush.msrb.mxu2 %v2267_v2 }
 0xa7d   :  { %2179 = vmatpush.msrb.mxu2 %v2266_v47 }
 0xadd   :  { %v1997_v45 = vpop.xlane.xlu1 %1996 }
 0xade   :  { %v2001_v36 = vmul.f32 %v1997_v45, %v2613_v19 }
 0xadf   :  { %v2007_v29 = vpop.xlane.xlu2 %2006 }
 0xae0   :  { %v2013_v49 = vmul.f32 %v2001_v36, %v2001_v36  ;;  %v2011_v7 = vmul.f32 %v2007_v29, %v2613_v19  ;;  %v2042_v1 = vsub.f32 %v3095_v34, %v2001_v36  ;;  %v2265_v29 = vld [vmem:[%s3193_s4 + $0x40] sm:$0xff]  ;;  %s2542_s4 = smov [#allocation7]  }
 0xae1   :  { %2180 = vmatpush.msrb.mxu2 %v2265_v29  ;;  %s2199_s19 = sshll.u32 %s2542_s4, 4  ;;  %s2200_s19 = int_to_ptr.vmem [resolvable:$true] %s2199_s19 }
 0xae2   :  { %v2015_v50 = vsub.f32 %v2011_v7, %v2013_v49 }
 0xae4   :  { %v2017_v51 = vadd.f32 1e-05, %v2015_v50 }
 0xae6   :  { %2434 = vrsqrt.f32 %v2017_v51  ;;  %vm2025_vm15 = vweird.f32 %v2017_v51 }
 0xaeb   :  { %v2000_v55 = vpop.xlane.xlu0 %1999 }
 0xaec   :  { %v2002_v33 = vmul.f32 %v2000_v55, %v2613_v19  ;;  %v2435_v44 = vpop.eup %2434 }
 0xaed   :  { %v2010_v32 = vpop.xlane.xlu1 %2009  ;;  %v2020_v56 = vmul.f32 %v2435_v44, %v2017_v51  ;;  %vm2026_vm8 = vweird.f32 %v2435_v44 }
 0xaee   :  { %v2014_v57 = vmul.f32 %v2002_v33, %v2002_v33  ;;  %v2012_v58 = vmul.f32 %v2010_v32, %v2613_v19  ;;  %vm2027_vm1 = vmor %vm2025_vm15, %vm2026_vm8  ;;  %v2043_v15 = vsub.f32 %v3107_v35, %v2002_v33 }
 0xaef   :  { %v2021_v40 = vmul.f32 %v2435_v44, %v2020_v56 }
 0xaf0   :  { %v2016_v11 = vsub.f32 %v2012_v58, %v2014_v57 }
 0xaf1   :  { %v2022_v61 = vmul.f32 0.5, %v2021_v40 }
 0xaf2   :  { %v2018_v42 = vadd.f32 1e-05, %v2016_v11 }
 0xaf3   :  { %v2023_v63 = vsub.f32 1.5, %v2022_v61 }
 0xaf4   :  { %2436 = vrsqrt.f32 %v2018_v42  ;;  %vm2035_vm3 = vweird.f32 %v2018_v42 }
 0xaf5   :  { %v2024_v4 = vmul.f32 %v2435_v44, %v2023_v63 }
 0xaf7   :  { %v2028_v5 = vsel %vm2027_vm1, %v2435_v44, %v2024_v4 }
 0xaf8   :  { %v2040_v6 = vmul.f32 %v2039_v3, %v2028_v5 }
 0xafa   :  { %v2437_v8 = vpop.eup %2436  ;;  %v2044_v19 = vmul.f32 %v2042_v1, %v2040_v6 }
 0xafb   :  { %v2030_v0 = vmul.f32 %v2437_v8, %v2018_v42  ;;  %vm2036_vm2 = vweird.f32 %v2437_v8 }
 0xafc   :  { %v2047_v9 = vadd.f32 %v2046_v43, %v2044_v19  ;;  %vm2037_vm4 = vmor %vm2035_vm3, %vm2036_vm2 }
 0xafd   :  { %v2031_v10 = vmul.f32 %v2437_v8, %v2030_v0 }
 0xafe   :  { %2307 = vmatmul.msk.f32.vlgmr.msra.gmra.mxu1 %vm79_vm0, %v2047_v9 }
 0xaff   :  { %v2032_v13 = vmul.f32 0.5, %v2031_v10 }
 0xb01   :  { %v2033_v54 = vsub.f32 1.5, %v2032_v13 }
 0xb03   :  { %v2034_v12 = vmul.f32 %v2437_v8, %v2033_v54 }
 0xb05   :  { %v2038_v14 = vsel %vm2037_vm4, %v2437_v8, %v2034_v12 }
 0xb06   :  { %v2041_v16 = vmul.f32 %v2039_v3, %v2038_v14 }
 0xb08   :  { %v2045_v17 = vmul.f32 %v2043_v15, %v2041_v16 }
 0xb0a   :  { %v2048_v18 = vadd.f32 %v2046_v43, %v2045_v17 }
 0xb0c   :  { %2308 = vmatmul.msk.f32.gmra.mxu1 %vm79_vm0, %v2048_v18 }
 0xb7b   :  { %v2073_v20 = vpop.f32.mrf.mxu1 }
 0xb7c   :  { %v3137_v21 = vadd.f32 %v2073_v20, %v2049_v48 }
 0xb7e   :  { %v3140_v22 = vmul.f32 0.70710677, %v3137_v21  ;;  %v2079_v52 = vmul.f32 0.5, %v3137_v21  ;;  %v2447_v21 = vld [vmem:[#allocation5 + $0x8] sm:$0xff] }
 0xb80   :  { %v2083_v23 = vand.u32 2147483647, %v3140_v22  ;;  %vm2149_vm8 = vcmp.ge.f32.partialorder %v3140_v22, 0.0 }
 0xb82   :  { %v2085_v24 = vmul.f32 0.3275911, %v2083_v23  ;;  %v2137_v55 = vsub.f32 0.0, %v2083_v23 }
 0xb84   :  { %v2087_v26 = vadd.f32 1.0, %v2085_v24  ;;  %v2139_v56 = vmul.f32 %v2137_v55, %v2083_v23 }
 0xb86   :  { %2438 = vrcp.f32 %v2087_v26  ;;  %v2100_v39 = vand.u32 2147483648, %v2087_v26  ;;  %v2098_v45 = vand.u32 2147483647, %v2087_v26  ;;  %vm2094_vm6 = vweird.f32 %v2087_v26 }
 0xb87   :  { %v2141_v61 = vmul.f32 1.442695, %v2139_v56 }
 0xb88   :  { %v2101_v7 = vor.u32 1.1754944e-38, %v2100_v39  ;;  %vm2099_vm9 = vcmp.eq.f32.partialorder %v2098_v45, 8.507059e+37 }
 0xb89   :  { %v2076_v27 = vpop.f32.mrf.mxu1 }
 0xb8a   :  { %v3149_v53 = vadd.f32 %v2076_v27, %v2049_v48 }
 0xb8c   :  { %v2439_v59 = vpop.eup %2438  ;;  %v3155_v62 = vmul.f32 0.70710677, %v3149_v53  ;;  %v2080_v22 = vmul.f32 0.5, %v3149_v53 }
 0xb8d   :  { %v2090_v30 = vmul.f32 %v2439_v59, %v2087_v26  ;;  %vm2095_vm5 = vweird.f32 %v2439_v59 }
 0xb8e   :  { %v2084_v31 = vand.u32 2147483647, %v3155_v62  ;;  %vm2096_vm7 = vmor %vm2094_vm6, %vm2095_vm5  ;;  %vm2150_vm15 = vcmp.ge.f32.partialorder %v3155_v62, 0.0 }
 0xb8f   :  { %v2091_v38 = vsub.f32 1.0, %v2090_v30 }
 0xb90   :  { %v2086_v46 = vmul.f32 0.3275911, %v2084_v31  ;;  %v2138_v19 = vsub.f32 0.0, %v2084_v31 }
 0xb91   :  { %v2092_v41 = vmul.f32 %v2439_v59, %v2091_v38 }
 0xb92   :  { %v2088_v36 = vadd.f32 1.0, %v2086_v46  ;;  %v2140_v14 = vmul.f32 %v2138_v19, %v2084_v31 }
 0xb93   :  { %v2093_v49 = vadd.f32 %v2439_v59, %v2092_v41  ;;  %v2190_v41 = vperm.slane %v2447_v21, 5 }
 0xb94   :  { %2440 = vrcp.f32 %v2088_v36  ;;  %v2115_v42 = vand.u32 2147483648, %v2088_v36  ;;  %v2113_v4 = vand.u32 2147483647, %v2088_v36  ;;  %vm2109_vm11 = vweird.f32 %v2088_v36 }
 0xb95   :  { %v2097_v50 = vsel %vm2096_vm7, %v2439_v59, %v2093_v49  ;;  %2442 = vpow2.f32 %v2141_v61  ;;  %v2143_v48 = vmul.f32 1.442695, %v2140_v14 }
 0xb96   :  { %v2102_v51 = vsel %vm2099_vm9, %v2101_v7, %v2097_v50  ;;  %v2116_v6 = vor.u32 1.1754944e-38, %v2115_v42  ;;  %vm2114_vm13 = vcmp.eq.f32.partialorder %v2113_v4, 8.507059e+37 }
 0xb97   :  { %v2119_v33 = vmul.f32 1.0614054, %v2102_v51  ;;  %2444 = vpow2.f32 %v2143_v48 }
 0xb99   :  { %v2121_v44 = vadd.f32 -1.4531521, %v2119_v33 }
 0xb9a   :  { %v2441_v32 = vpop.eup %2440 }
 0xb9b   :  { %v2123_v57 = vmul.f32 %v2121_v44, %v2102_v51  ;;  %v2105_v58 = vmul.f32 %v2441_v32, %v2088_v36  ;;  %vm2110_vm10 = vweird.f32 %v2441_v32  ;;  %v2443_v12 = vpop.eup %2442 }
 0xb9c   :  { %vm2111_vm12 = vmor %vm2109_vm11, %vm2110_vm10 }
 0xb9d   :  { %v2125_v40 = vadd.f32 1.4214138, %v2123_v57  ;;  %v2106_v11 = vsub.f32 1.0, %v2105_v58  ;;  %v2445_v30 = vpop.eup %2444 }
 0xb9f   :  { %v2127_v63 = vmul.f32 %v2125_v40, %v2102_v51  ;;  %v2107_v3 = vmul.f32 %v2441_v32, %v2106_v11 }
 0xba1   :  { %v2129_v5 = vadd.f32 -0.28449672, %v2127_v63  ;;  %v2108_v1 = vadd.f32 %v2441_v32, %v2107_v3 }
 0xba3   :  { %v2131_v43 = vmul.f32 %v2129_v5, %v2102_v51  ;;  %v2112_v8 = vsel %vm2111_vm12, %v2441_v32, %v2108_v1 }
 0xba4   :  { %v2117_v0 = vsel %vm2114_vm13, %v2116_v6, %v2112_v8 }
 0xba5   :  { %v2133_v9 = vadd.f32 0.2548296, %v2131_v43  ;;  %v2120_v10 = vmul.f32 1.0614054, %v2117_v0 }
 0xba7   :  { %v2135_v13 = vmul.f32 %v2133_v9, %v2102_v51  ;;  %v2122_v54 = vadd.f32 -1.4531521, %v2120_v10 }
 0xba9   :  { %v2145_v15 = vmul.f32 %v2443_v12, %v2135_v13  ;;  %v2124_v16 = vmul.f32 %v2122_v54, %v2117_v0 }
 0xbab   :  { %v2147_v17 = vsub.f32 1.0, %v2145_v15  ;;  %v2126_v18 = vadd.f32 1.4214138, %v2124_v16 }
 0xbad   :  { %v2151_v20 = vsub.f32 0.0, %v2147_v17  ;;  %v2128_v23 = vmul.f32 %v2126_v18, %v2117_v0 }
 0xbaf   :  { %v2153_v24 = vsel %vm2149_vm8, %v2147_v17, %v2151_v20  ;;  %v2130_v26 = vadd.f32 -0.28449672, %v2128_v23 }
 0xbb0   :  { %v2155_v25 = vadd.f32 1.0, %v2153_v24 }
 0xbb1   :  { %v2132_v27 = vmul.f32 %v2130_v26, %v2117_v0 }
 0xbb2   :  { %v2157_v28 = vmul.f32 %v2155_v25, %v2079_v52 }
 0xbb3   :  { %v2134_v59 = vadd.f32 0.2548296, %v2132_v27 }
 0xbb4   :  { %2309 = vmatmul.msk.f32.vlgmr.msrb.gmra.mxu2 %vm1093_vm14, %v2157_v28 }
 0xbb5   :  { %v2136_v60 = vmul.f32 %v2134_v59, %v2117_v0 }
 0xbb7   :  { %v2146_v31 = vmul.f32 %v2445_v30, %v2136_v60 }
 0xbb9   :  { %v2148_v37 = vsub.f32 1.0, %v2146_v31 }
 0xbbb   :  { %v2152_v38 = vsub.f32 0.0, %v2148_v37 }
 0xbbd   :  { %v2154_v39 = vsel %vm2150_vm15, %v2148_v37, %v2152_v38 }
 0xbbe   :  { %v2156_v46 = vadd.f32 1.0, %v2154_v39 }
 0xbc0   :  { %v2158_v2 = vmul.f32 %v2156_v46, %v2080_v22 }
 0xbc2   :  { %2310 = vmatmul.msk.f32.gmra.mxu2 %vm1093_vm14, %v2158_v2 }
 0xc37   :  { %v2182_v45 = vpop.f32.mrf.mxu2 }
 0xc38   :  { %v2188_v36 = vadd.f32 %v2182_v45, %v3095_v34 }
 0xc3a   :  { %v2191_v47 = vadd.f32 %v2190_v41, %v2188_v36 }
 0xc3c   :  { %2193 = vst.msk [vmem:[#allocation7] sm:$0xff] %vm79_vm0, %v2191_v47 }
 0xc45   :  { %v2185_v29 = vpop.f32.mrf.mxu2 }
 0xc46   :  { %v2189_v53 = vadd.f32 %v2185_v29, %v3107_v35 }
 0xc48   :  { %v2192_v62 = vadd.f32 %v2190_v41, %v2189_v53 }
 0xc4a   :  { %2194 = vst.msk [vmem:[#allocation7 + $0x8] sm:$0xff] %vm79_vm0, %v2192_v62 }
 0xc4b   :  { %2207 = dma.vmem_to_hbm [thread:$0]  %s2200_s19, 256, %s2202_s2, [#allocation4], %s2527_s29, %s2527_s29, %s2528_s30  }
 0xc4c   :  { %2524 = dma.done.wait [#allocation4], 256  }
 0xc4d   :  { %2525 = vsyncadd [#allocation4], 4294967040 }
 0xc4e   :  { %2212 = vsyncpa [#allocation3], 1 }
 0xc4f   :  { %2213 = vsyncpa [#allocation6], 1 }
 0xc50   :  { %2214 = vsyncpa [#allocation4], 1 }

</bundles_post_ra>
